<compile_context>
chip_gen: v7x
topology: tpu7x:2x2x1
jax: 0.10.0
libtpu: 0.0.40
codegen_flags: <defaults>
</compile_context>

<pallas_src>
import functools

import jax
import jax.numpy as jnp
from jax.experimental import pallas as pl
from jax.experimental.pallas import tpu as pltpu

INPUT_SIZE = 1
HIDDEN_SIZES = [128, 128, 128, 128]
OUTPUT_SIZE = 256

# Covers the tile_b=2048 working set (~12-16 MiB incl. double buffers) with
# headroom; above v5e's 16 MiB scoped default, well under v7x's 64 MiB physical.
_VMEM_LIMIT_BYTES = 32 * 1024 * 1024

_SQRT_HALF = 0.7071067811865476
_SQRT_2_OVER_PI = 0.7978845608028654


def _gelu(x, approximate):
    if approximate:
        # tanh-form GELU: the transcendental rides the (otherwise idle) EUP slot
        # and the VALU op count drops ~3x.  Deviates from exact GELU by up to
        # ~5e-4 per activation, so it is opt-in, not the default.
        return 0.5 * x * (1.0 + jnp.tanh(_SQRT_2_OVER_PI * (x + 0.044715 * (x * x * x))))
    # PyTorch nn.GELU() default = exact erf-based GELU (module semantics).
    return 0.5 * x * (1.0 + jax.lax.erf(x * _SQRT_HALF))


def mlp_kernel(x_ref,
               w1_ref, b1_ref,
               w2_ref, b2_ref,
               w3_ref, b3_ref,
               w4_ref, b4_ref,
               w5_ref, b5_ref,
               o_ref,
               *, approximate_gelu, matmul_dtype):
    def dense(h, w_ref, b_ref):
        w = w_ref[...]
        if matmul_dtype is not None:
            # bf16 MXU inputs, f32 accumulation (opt-in fast path for v6e/v7x).
            h_in = h.astype(matmul_dtype)
            w = w.astype(matmul_dtype)
        else:
            h_in = h
        return jnp.dot(h_in, w, preferred_element_type=jnp.float32) + b_ref[...]

    x = x_ref[...].astype(jnp.float32)                       # (tb, 1)

    # Layer 1: contraction depth is 1, so x @ W1 is a broadcast multiply --
    # do it on the VPU and skip one MXU round trip.
    h = _gelu(x * w1_ref[...] + b1_ref[...], approximate_gelu)   # (tb,1)*(1,128)+(1,128)

    # Hidden layers 2..4 (MXU matmuls, f32 accumulation) + output layer.
    h = _gelu(dense(h, w2_ref, b2_ref), approximate_gelu)
    h = _gelu(dense(h, w3_ref, b3_ref), approximate_gelu)
    h = _gelu(dense(h, w4_ref, b4_ref), approximate_gelu)
    out = dense(h, w5_ref, b5_ref)                            # no activation
    o_ref[...] = out.astype(o_ref.dtype)


def _mlp_pallas_call(x, params, tile_b, approximate_gelu, matmul_dtype):
    """x: (B_pad, 1) with B_pad % tile_b == 0. params: list of (W:(in,out), b:(1,out))."""
    B, in_dim = x.shape
    out_dim = params[-1][0].shape[1]

    # Weights / biases are tiny (~0.33 MiB f32 total): full blocks with a constant
    # index_map so they stay resident in VMEM across all batch tiles (no re-DMA).
    def full_spec(shape):
        return pl.BlockSpec(shape, lambda i: (0, 0))

    in_specs = [pl.BlockSpec((tile_b, in_dim), lambda i: (i, 0))]
    flat_args = [x]
    for w, b in params:
        in_specs.append(full_spec(w.shape))
        in_specs.append(full_spec(b.shape))
        flat_args += [w, b]

    kernel = functools.partial(mlp_kernel,
                               approximate_gelu=approximate_gelu,
                               matmul_dtype=matmul_dtype)

    return pl.pallas_call(
        kernel,
        out_shape=jax.ShapeDtypeStruct((B, out_dim), x.dtype),
        grid_spec=pltpu.PrefetchScalarGridSpec(
            num_scalar_prefetch=0,
            grid=(B // tile_b,),
            in_specs=in_specs,
            out_specs=pl.BlockSpec((tile_b, out_dim), lambda i: (i, 0)),
        ),
        compiler_params=pltpu.CompilerParams(
            dimension_semantics=("parallel",),   # megacore sharding of batch tiles
            vmem_limit_bytes=_VMEM_LIMIT_BYTES,
        ),
    )(*flat_args)


def _round_up(n, m):
    return ((n + m - 1) // m) * m


def _choose_tile(batch, tile_b):
    """Sublane-aligned batch tile; for batch >= 16 force grid >= 2 so both v7x
    TensorCores get work under dimension_semantics=("parallel",)."""
    if batch >= 16:
        tb = min(tile_b, _round_up((batch + 1) // 2, 8))
    else:
        tb = _round_up(max(batch, 1), 8)
    return max(8, (tb // 8) * 8)


@functools.partial(jax.jit,
                   static_argnames=("tile_b", "approximate_gelu", "matmul_dtype"))
def mlp_forward(x, params, tile_b=2048, approximate_gelu=False, matmul_dtype=None):
    """x: (B, 1) float32.  params: list of (W:(in,out), b:(1,out)).

    Defaults preserve the PyTorch module semantics (exact erf GELU, f32 matmuls).
    approximate_gelu=True / matmul_dtype=jnp.bfloat16 enable the faster EUP-GELU /
    bf16-MXU path (looser numerics, ~1e-2)."""
    B, in_dim = x.shape
    assert in_dim == INPUT_SIZE

    tb = _choose_tile(B, tile_b)
    b_pad = _round_up(B, tb)
    if b_pad != B:
        x = jnp.pad(x, ((0, b_pad - B), (0, 0)))   # padded rows sliced off below

    out = _mlp_pallas_call(x, params, tb, approximate_gelu, matmul_dtype)
    if b_pad != B:
        out = out[:B]
    return out


def init_params(key):
    """Deterministic init. Shapes mirror nn.Linear(prev, size) for
    hidden_sizes=[128,128,128,128] and output_layer Linear(128, 256).
    Weights stored as (in, out) so the kernel computes y = x @ W + b."""
    sizes = [INPUT_SIZE] + HIDDEN_SIZES + [OUTPUT_SIZE]
    params = []
    for fan_in, fan_out in zip(sizes[:-1], sizes[1:]):
        key, kw, kb = jax.random.split(key, 3)
        bound = 1.0 / jnp.sqrt(fan_in)  # same scale as PyTorch Linear default
        w = jax.random.uniform(kw, (fan_in, fan_out), jnp.float32, -bound, bound)
        b = jax.random.uniform(kb, (1, fan_out), jnp.float32, -bound, bound)
        params.append((w, b))
    return params


def mlp_reference(x, params):
    h = x
    for i, (w, b) in enumerate(params):
        h = h @ w + b
        if i < len(params) - 1:
            h = jax.nn.gelu(h, approximate=False)   # nn.GELU() default
    return h


if __name__ == "__main__":
    key = jax.random.PRNGKey(0)
    key, kx = jax.random.split(key)

    B = 256  # batch of collocation points; each point is a scalar input
    x = jax.random.normal(kx, (B, INPUT_SIZE), dtype=jnp.float32)
    params = init_params(key)
    ref = mlp_reference(x, params)

    # Default path: exact erf-GELU, f32 MXU inputs (module semantics).
    # B=256 -> tile 128, grid=(2,) so both v7x TensorCores are used.
    out = jax.block_until_ready(mlp_forward(x, params))
    assert out.shape == (B, OUTPUT_SIZE), out.shape
    assert jnp.allclose(out, ref, atol=1e-4, rtol=1e-4), float(
        jnp.max(jnp.abs(out - ref)))

    # Ragged batch exercises the pad + slice path (200 -> tile 104, grid=(2,)).
    out2 = jax.block_until_ready(mlp_forward(x[:200], params))
    assert jnp.allclose(out2, ref[:200], atol=1e-4, rtol=1e-4), float(
        jnp.max(jnp.abs(out2 - ref[:200])))

    # Opt-in fast path: tanh-GELU on the EUP + bf16 MXU inputs (f32 accumulate).
    # Looser tolerance because it intentionally relaxes the numerics contract.
    out_fast = jax.block_until_ready(
        mlp_forward(x, params, approximate_gelu=True, matmul_dtype=jnp.bfloat16))
    assert jnp.allclose(out_fast, ref, atol=5e-2, rtol=5e-2), float(
        jnp.max(jnp.abs(out_fast - ref)))

    print("KERNEL_OK")
</pallas_src>

<mosaic_0001>
module attributes {stable_mosaic.version = 11 : i64} {
  func.func @mlp_kernel(%arg0: i32, %arg1: memref<128x1xf32, #tpu.memory_space<vmem>>, %arg2: memref<1x128xf32, #tpu.memory_space<vmem>>, %arg3: memref<1x128xf32, #tpu.memory_space<vmem>>, %arg4: memref<128x128xf32, #tpu.memory_space<vmem>>, %arg5: memref<1x128xf32, #tpu.memory_space<vmem>>, %arg6: memref<128x128xf32, #tpu.memory_space<vmem>>, %arg7: memref<1x128xf32, #tpu.memory_space<vmem>>, %arg8: memref<128x128xf32, #tpu.memory_space<vmem>>, %arg9: memref<1x128xf32, #tpu.memory_space<vmem>>, %arg10: memref<128x256xf32, #tpu.memory_space<vmem>>, %arg11: memref<1x256xf32, #tpu.memory_space<vmem>>, %arg12: memref<128x256xf32, #tpu.memory_space<vmem>>) attributes {dimension_semantics = [#tpu.dimension_semantics<parallel>], iteration_bounds = array<i64: 2>, scalar_prefetch = 0 : i64, scratch_operands = 0 : i64, tpu.core_type = #tpu.core_type<tc>, window_params = [{transform_indices = @transform_0, window_bounds = array<i64: 128, 1>}, {pipeline_mode = #tpu.pipeline_mode<synchronous>, transform_indices = @transform_1, window_bounds = array<i64: 1, 128>}, {pipeline_mode = #tpu.pipeline_mode<synchronous>, transform_indices = @transform_2, window_bounds = array<i64: 1, 128>}, {pipeline_mode = #tpu.pipeline_mode<synchronous>, transform_indices = @transform_3, window_bounds = array<i64: 128, 128>}, {pipeline_mode = #tpu.pipeline_mode<synchronous>, transform_indices = @transform_4, window_bounds = array<i64: 1, 128>}, {pipeline_mode = #tpu.pipeline_mode<synchronous>, transform_indices = @transform_5, window_bounds = array<i64: 128, 128>}, {pipeline_mode = #tpu.pipeline_mode<synchronous>, transform_indices = @transform_6, window_bounds = array<i64: 1, 128>}, {pipeline_mode = #tpu.pipeline_mode<synchronous>, transform_indices = @transform_7, window_bounds = array<i64: 128, 128>}, {pipeline_mode = #tpu.pipeline_mode<synchronous>, transform_indices = @transform_8, window_bounds = array<i64: 1, 128>}, {pipeline_mode = #tpu.pipeline_mode<synchronous>, transform_indices = @transform_9, window_bounds = array<i64: 128, 256>}, {pipeline_mode = #tpu.pipeline_mode<synchronous>, transform_indices = @transform_10, window_bounds = array<i64: 1, 256>}, {transform_indices = @transform_11, window_bounds = array<i64: 128, 256>}]} {
    %c0 = arith.constant 0 : index
    %c0_0 = arith.constant 0 : index
    %0 = vector.load %arg1[%c0, %c0_0] : memref<128x1xf32, #tpu.memory_space<vmem>>, vector<128x1xf32>
    %c0_1 = arith.constant 0 : index
    %c0_2 = arith.constant 0 : index
    %1 = vector.load %arg2[%c0_1, %c0_2] : memref<1x128xf32, #tpu.memory_space<vmem>>, vector<1x128xf32>
    %2 = vector.broadcast %0 : vector<128x1xf32> to vector<128x128xf32>
    %3 = vector.broadcast %1 : vector<1x128xf32> to vector<128x128xf32>
    %4 = arith.mulf %2, %3 : vector<128x128xf32>
    %c0_3 = arith.constant 0 : index
    %c0_4 = arith.constant 0 : index
    %5 = vector.load %arg3[%c0_3, %c0_4] : memref<1x128xf32, #tpu.memory_space<vmem>>, vector<1x128xf32>
    %6 = vector.broadcast %5 : vector<1x128xf32> to vector<128x128xf32>
    %7 = arith.addf %4, %6 : vector<128x128xf32>
    %cst = arith.constant 5.000000e-01 : f32
    %8 = vector.broadcast %cst : f32 to vector<128x128xf32>
    %9 = arith.mulf %8, %7 : vector<128x128xf32>
    %cst_5 = arith.constant 0.707106769 : f32
    %10 = vector.broadcast %cst_5 : f32 to vector<128x128xf32>
    %11 = arith.mulf %7, %10 : vector<128x128xf32>
    %12 = math.erf %11 : vector<128x128xf32>
    %cst_6 = arith.constant 1.000000e+00 : f32
    %13 = vector.broadcast %cst_6 : f32 to vector<128x128xf32>
    %14 = arith.addf %13, %12 : vector<128x128xf32>
    %15 = arith.mulf %9, %14 : vector<128x128xf32>
    %c0_7 = arith.constant 0 : index
    %c0_8 = arith.constant 0 : index
    %16 = vector.load %arg4[%c0_7, %c0_8] : memref<128x128xf32, #tpu.memory_space<vmem>>, vector<128x128xf32>
    %cst_9 = arith.constant dense<0.000000e+00> : vector<128x128xf32>
    %17 = tpu.matmul %15, %16, %cst_9 {dimension_numbers = #tpu.dot_dimension_numbers<[1], [0], [0], [1], [0, 0, 1, 1], [], []>} : vector<128x128xf32>, vector<128x128xf32>, vector<128x128xf32> -> vector<128x128xf32>
    %c0_10 = arith.constant 0 : index
    %c0_11 = arith.constant 0 : index
    %18 = vector.load %arg5[%c0_10, %c0_11] : memref<1x128xf32, #tpu.memory_space<vmem>>, vector<1x128xf32>
    %19 = vector.broadcast %18 : vector<1x128xf32> to vector<128x128xf32>
    %20 = arith.addf %17, %19 : vector<128x128xf32>
    %cst_12 = arith.constant 5.000000e-01 : f32
    %21 = vector.broadcast %cst_12 : f32 to vector<128x128xf32>
    %22 = arith.mulf %21, %20 : vector<128x128xf32>
    %cst_13 = arith.constant 0.707106769 : f32
    %23 = vector.broadcast %cst_13 : f32 to vector<128x128xf32>
    %24 = arith.mulf %20, %23 : vector<128x128xf32>
    %25 = math.erf %24 : vector<128x128xf32>
    %cst_14 = arith.constant 1.000000e+00 : f32
    %26 = vector.broadcast %cst_14 : f32 to vector<128x128xf32>
    %27 = arith.addf %26, %25 : vector<128x128xf32>
    %28 = arith.mulf %22, %27 : vector<128x128xf32>
    %c0_15 = arith.constant 0 : index
    %c0_16 = arith.constant 0 : index
    %29 = vector.load %arg6[%c0_15, %c0_16] : memref<128x128xf32, #tpu.memory_space<vmem>>, vector<128x128xf32>
    %cst_17 = arith.constant dense<0.000000e+00> : vector<128x128xf32>
    %30 = tpu.matmul %28, %29, %cst_17 {dimension_numbers = #tpu.dot_dimension_numbers<[1], [0], [0], [1], [0, 0, 1, 1], [], []>} : vector<128x128xf32>, vector<128x128xf32>, vector<128x128xf32> -> vector<128x128xf32>
    %c0_18 = arith.constant 0 : index
    %c0_19 = arith.constant 0 : index
    %31 = vector.load %arg7[%c0_18, %c0_19] : memref<1x128xf32, #tpu.memory_space<vmem>>, vector<1x128xf32>
    %32 = vector.broadcast %31 : vector<1x128xf32> to vector<128x128xf32>
    %33 = arith.addf %30, %32 : vector<128x128xf32>
    %cst_20 = arith.constant 5.000000e-01 : f32
    %34 = vector.broadcast %cst_20 : f32 to vector<128x128xf32>
    %35 = arith.mulf %34, %33 : vector<128x128xf32>
    %cst_21 = arith.constant 0.707106769 : f32
    %36 = vector.broadcast %cst_21 : f32 to vector<128x128xf32>
    %37 = arith.mulf %33, %36 : vector<128x128xf32>
    %38 = math.erf %37 : vector<128x128xf32>
    %cst_22 = arith.constant 1.000000e+00 : f32
    %39 = vector.broadcast %cst_22 : f32 to vector<128x128xf32>
    %40 = arith.addf %39, %38 : vector<128x128xf32>
    %41 = arith.mulf %35, %40 : vector<128x128xf32>
    %c0_23 = arith.constant 0 : index
    %c0_24 = arith.constant 0 : index
    %42 = vector.load %arg8[%c0_23, %c0_24] : memref<128x128xf32, #tpu.memory_space<vmem>>, vector<128x128xf32>
    %cst_25 = arith.constant dense<0.000000e+00> : vector<128x128xf32>
    %43 = tpu.matmul %41, %42, %cst_25 {dimension_numbers = #tpu.dot_dimension_numbers<[1], [0], [0], [1], [0, 0, 1, 1], [], []>} : vector<128x128xf32>, vector<128x128xf32>, vector<128x128xf32> -> vector<128x128xf32>
    %c0_26 = arith.constant 0 : index
    %c0_27 = arith.constant 0 : index
    %44 = vector.load %arg9[%c0_26, %c0_27] : memref<1x128xf32, #tpu.memory_space<vmem>>, vector<1x128xf32>
    %45 = vector.broadcast %44 : vector<1x128xf32> to vector<128x128xf32>
    %46 = arith.addf %43, %45 : vector<128x128xf32>
    %cst_28 = arith.constant 5.000000e-01 : f32
    %47 = vector.broadcast %cst_28 : f32 to vector<128x128xf32>
    %48 = arith.mulf %47, %46 : vector<128x128xf32>
    %cst_29 = arith.constant 0.707106769 : f32
    %49 = vector.broadcast %cst_29 : f32 to vector<128x128xf32>
    %50 = arith.mulf %46, %49 : vector<128x128xf32>
    %51 = math.erf %50 : vector<128x128xf32>
    %cst_30 = arith.constant 1.000000e+00 : f32
    %52 = vector.broadcast %cst_30 : f32 to vector<128x128xf32>
    %53 = arith.addf %52, %51 : vector<128x128xf32>
    %54 = arith.mulf %48, %53 : vector<128x128xf32>
    %c0_31 = arith.constant 0 : index
    %c0_32 = arith.constant 0 : index
    %55 = vector.load %arg10[%c0_31, %c0_32] : memref<128x256xf32, #tpu.memory_space<vmem>>, vector<128x256xf32>
    %cst_33 = arith.constant dense<0.000000e+00> : vector<128x256xf32>
    %56 = tpu.matmul %54, %55, %cst_33 {dimension_numbers = #tpu.dot_dimension_numbers<[1], [0], [0], [1], [0, 0, 1, 1], [], []>} : vector<128x128xf32>, vector<128x256xf32>, vector<128x256xf32> -> vector<128x256xf32>
    %c0_34 = arith.constant 0 : index
    %c0_35 = arith.constant 0 : index
    %57 = vector.load %arg11[%c0_34, %c0_35] : memref<1x256xf32, #tpu.memory_space<vmem>>, vector<1x256xf32>
    %58 = vector.broadcast %57 : vector<1x256xf32> to vector<128x256xf32>
    %59 = arith.addf %56, %58 : vector<128x256xf32>
    %c0_36 = arith.constant 0 : index
    %c0_37 = arith.constant 0 : index
    %60 = vector.load %arg12[%c0_36, %c0_37] : memref<128x256xf32, #tpu.memory_space<vmem>>, vector<128x256xf32>
    tpu.vector_store %arg12[%c0_36, %c0_37], %59 {strides = array<i32>} : memref<128x256xf32, #tpu.memory_space<vmem>>, vector<128x256xf32>,
    return
  }
  func.func @transform_0(%arg0: i32) -> (i32, i32) {
    %c0_i32 = arith.constant 0 : i32
    %c0_i32_0 = arith.constant 0 : i32
    return %arg0, %c0_i32 : i32, i32
  }
  func.func @transform_1(%arg0: i32) -> (i32, i32) {
    %c0_i32 = arith.constant 0 : i32
    %c0_i32_0 = arith.constant 0 : i32
    %c0_i32_1 = arith.constant 0 : i32
    return %c0_i32, %c0_i32_0 : i32, i32
  }
  func.func @transform_2(%arg0: i32) -> (i32, i32) {
    %c0_i32 = arith.constant 0 : i32
    %c0_i32_0 = arith.constant 0 : i32
    %c0_i32_1 = arith.constant 0 : i32
    return %c0_i32, %c0_i32_0 : i32, i32
  }
  func.func @transform_3(%arg0: i32) -> (i32, i32) {
    %c0_i32 = arith.constant 0 : i32
    %c0_i32_0 = arith.constant 0 : i32
    %c0_i32_1 = arith.constant 0 : i32
    return %c0_i32, %c0_i32_0 : i32, i32
  }
  func.func @transform_4(%arg0: i32) -> (i32, i32) {
    %c0_i32 = arith.constant 0 : i32
    %c0_i32_0 = arith.constant 0 : i32
    %c0_i32_1 = arith.constant 0 : i32
    return %c0_i32, %c0_i32_0 : i32, i32
  }
  func.func @transform_5(%arg0: i32) -> (i32, i32) {
    %c0_i32 = arith.constant 0 : i32
    %c0_i32_0 = arith.constant 0 : i32
    %c0_i32_1 = arith.constant 0 : i32
    return %c0_i32, %c0_i32_0 : i32, i32
  }
  func.func @transform_6(%arg0: i32) -> (i32, i32) {
    %c0_i32 = arith.constant 0 : i32
    %c0_i32_0 = arith.constant 0 : i32
    %c0_i32_1 = arith.constant 0 : i32
    return %c0_i32, %c0_i32_0 : i32, i32
  }
  func.func @transform_7(%arg0: i32) -> (i32, i32) {
    %c0_i32 = arith.constant 0 : i32
    %c0_i32_0 = arith.constant 0 : i32
    %c0_i32_1 = arith.constant 0 : i32
    return %c0_i32, %c0_i32_0 : i32, i32
  }
  func.func @transform_8(%arg0: i32) -> (i32, i32) {
    %c0_i32 = arith.constant 0 : i32
    %c0_i32_0 = arith.constant 0 : i32
    %c0_i32_1 = arith.constant 0 : i32
    return %c0_i32, %c0_i32_0 : i32, i32
  }
  func.func @transform_9(%arg0: i32) -> (i32, i32) {
    %c0_i32 = arith.constant 0 : i32
    %c0_i32_0 = arith.constant 0 : i32
    %c0_i32_1 = arith.constant 0 : i32
    return %c0_i32, %c0_i32_0 : i32, i32
  }
  func.func @transform_10(%arg0: i32) -> (i32, i32) {
    %c0_i32 = arith.constant 0 : i32
    %c0_i32_0 = arith.constant 0 : i32
    %c0_i32_1 = arith.constant 0 : i32
    return %c0_i32, %c0_i32_0 : i32, i32
  }
  func.func @transform_11(%arg0: i32) -> (i32, i32) {
    %c0_i32 = arith.constant 0 : i32
    %c0_i32_0 = arith.constant 0 : i32
    return %arg0, %c0_i32 : i32, i32
  }
}

</mosaic_0001>

<bundles_post_ra>
// kernel: mlp_forward.1
= control target key start
LH: loop header
LB: loop body
LE: loop exit
PB: predicated region body
PF: predicated region fallthrough
CT: control target
= control target key end

     0   :  { %s3225_s0 = inlined_call_operand.vmem [shape: f32[256,1], index: 0, kind: input, shape index: {}]   ;;  %s3226_s1 = inlined_call_operand.vmem [shape: f32[1,128], index: 1, kind: input, shape index: {}]   ;;  %s3227_s2 = inlined_call_operand.vmem [shape: f32[1,128], index: 2, kind: input, shape index: {}]   ;;  %s3228_s3 = inlined_call_operand.hbm [shape: f32[128,128], index: 3, kind: input, shape index: {}]   ;;  %s3229_s4 = inlined_call_operand.vmem [shape: f32[1,128], index: 4, kind: input, shape index: {}]   ;;  %s3230_s5 = inlined_call_operand.hbm [shape: f32[128,128], index: 5, kind: input, shape index: {}]   ;;  %s3231_s6 = inlined_call_operand.vmem [shape: f32[1,128], index: 6, kind: input, shape index: {}]   ;;  %s3232_s7 = inlined_call_operand.hbm [shape: f32[128,128], index: 7, kind: input, shape index: {}]   ;;  %s3233_s8 = inlined_call_operand.vmem [shape: f32[1,128], index: 8, kind: input, shape index: {}]   ;;  %s3234_s9 = inlined_call_operand.vmem [shape: f32[128,256], index: 9, kind: input, shape index: {}]   ;;  %s3235_s10 = inlined_call_operand.vmem [shape: f32[1,256], index: 10, kind: input, shape index: {}]   ;;  %s3236_s11 = inlined_call_operand.hbm [shape: f32[256,256], index: 11, kind: output, shape index: {}]  }
   0x1   :  { %3247 = sst [smem:[#allocation18_spill]] %s3236_s11 }
   0x2   :  { %16 = vsyncpa [#allocation3], 0 }
   0x3   :  { %17 = vsyncpa [#allocation6], 0 }
   0x4   :  { %18 = vsyncpa [#allocation4], 0 }
   0x5   :  { %20 = vsyncpa [#allocation4 + $0x1], 0  ;;  %s2609_s17 = smov 0   ;;  %s2611_s18 = smov 0  }
   0x6   :  { %s2613_s19 = smov 0   ;;  %s2615_s20 = smov 0  }
   0x7 LB: > { %3248 = sst [smem:[#allocation12_spill]] %s2525_s17  ;;  %s2630_s21 = sadd.s32 4294967295, %s2537_s20   ;;  %s2537_s20 = sphi %s2615_s20, %s3270_s20   ;;  %s2533_s19 = sphi %s2613_s19, %s3272_s19   ;;  %s2529_s18 = sphi %s2611_s18, %s3274_s18   ;;  %s2525_s17 = sphi %s2609_s17, %s3273_s17  }
   0x8   : > { %3249 = sst [smem:[#allocation13_spill]] %s2533_s19  ;;  %s1743_s22 = sadd.s32 4294967294, %s2537_s20  }
   0x9   : > { %3250 = sst [smem:[#allocation14_spill]] %s2537_s20  ;;  %s2634_s23 = sadd.s32 1, %s2537_s20  }
   0xa   : > { %3251 = sst [smem:[#allocation15_spill]] %s2634_s23  ;;  %s269_s24 = sadd.s32 1, %s2533_s19 }
   0xb   : > { %s266_s25 = ssub.s32 %s2537_s20, %s2634_s23  ;;  %p279_p0 = scmp.ne.s32.totalorder %s2533_s19, %s2529_s18 }
   0xc   : > { %p267_p1 = scmp.eq.s32.totalorder %s266_s25, 0  ;;  %p280_p2 = scmp.eq.s32.totalorder %s2630_s21, 1 }
   0xd   : > { %p285_p3 = scmp.ne.s32.totalorder %s2529_s18, %s2525_s17  ;;  %p286_p4 = scmp.eq.s32.totalorder %s1743_s22, 1 }
   0xe   : > { %s2645_s26 = scalar_select %p267_p1, %s2533_s19, %s269_s24  }
   0xf   : > { %p2647_p5 = por %p280_p2, %p279_p0  ;;  %p2651_p6 = por %p286_p4, %p285_p3 }
  0x10   : > { %3252 = sst [smem:[#allocation16_spill]] %s2645_s26  ;;  %p1744_p7 = scmp.ge.s32.totalorder %s2537_s20, 1 }
  0x11   : > { %s3253_s27 = scalar_select %p2647_p5, 1, 0 }
  0x12   : > { %s3254_s28 = scalar_select %p2651_p6, 1, 0 }
  0x13   : > { %p293_p8 = scmp.lt.s32.totalorder %s2537_s20, 3  ;;  %p3240_p9 = scmp.eq.s32.totalorder %s2630_s21, 0 }
  0x14   : > { %3255 = sst [smem:[#allocation17_spill]] %s3254_s28  ;;  %s2539_s30 = smov [#allocation5]  }
  0x15   : > { %p2658_p10 = pnand %p1744_p7, %p293_p8  ;;  %s327_s12 = sshll.u32 %s2539_s30, 4  ;;  %s2664_s12 = int_to_ptr.vmem [resolvable:$true] %s327_s12 }
  0x16   : > { %s2540_s14 = smov [#allocation2]   ;;  %s2541_s16 = smov [#allocation7]  }
  0x17   : > { %s3256_s29 = scalar_select %p2658_p10, 1, 0 }
  0x18   : > { %p2191_p11 = pneg %p2658_p10  ;;  %s311_s15 = sshll.u32 %s2540_s14, 4  ;;  %s2672_s15 = int_to_ptr.vmem [resolvable:$true] %s311_s15 }
  0x19   : > { %s2674_s22 = sshll.u32 %s2541_s16, 4  ;;  %s2383_s26 = scalar_lea.hbm %s3230_s5, 2048  ;;  %s344_s22 = int_to_ptr.vmem [resolvable:$true] %s2674_s22 }
  0x1a   : > { %p2668_p12 = pnand %p3240_p9, %p2191_p11  ;;  %p2384_p13 = scmp.ne.s32.totalorder %s3230_s5, %s2383_s26 }
  0x1b   : > { %p2390_p3 = scmp.lt.u32.totalorder %s2383_s26, %s3230_s5 }
  0x1c   : > { %p2684_p0 = pneg %p2668_p12 }
  0x1e   : > { %p2386_p1 = pnand %p2684_p0, %p2384_p13 }
  0x20   : > { %p2387_p2 = pneg %p2386_p1 }
  0x22   : > { %p2392_p4 = pnand %p2390_p3, %p2387_p2 }
  0x24   : > { %2395 = shalt.err (!%p2392_p4)
}
  0x25   : > { %s2396_s19 = scalar_lea.vmem %s2664_s12, 2048  ;;  %p2404_p9 = scmp.lt.s32.totalorder %s2664_s12, %s2664_s12 }
  0x26   : > { %p2397_p7 = scmp.ne.s32.totalorder %s2664_s12, %s2396_s19  ;;  %p2405_p6 = scmp.lt.s32.totalorder %s2396_s19, %s2396_s19 }
  0x28   : > { %p2399_p8 = pnand %p2397_p7, %p2684_p0  ;;  %p2406_p13 = por %p2405_p6, %p2404_p9 }
  0x2a   : > { %p2400_p11 = pneg %p2399_p8 }
  0x2c   : > { %p2407_p1 = pnand %p2406_p13, %p2400_p11 }
  0x2e   : > { %2410 = shalt.err (!%p2407_p1)
}
  0x2f   : > { %s2542_s24 = smov 128   ;;  %s2543_s26 = smov 8  }
  0x30   : > { %2197 = dma.hbm_to_vmem [thread:$0]  (!%p2668_p12), %s3230_s5, 2048, %s2664_s12, [#allocation6], %s2542_s24, %s2542_s24, %s2543_s26  }
  0x31   : > { %s2411_s19 = scalar_lea.hbm %s3228_s3, 2048 }
  0x32   : > { %p2412_p6 = scmp.ne.s32.totalorder %s3228_s3, %s2411_s19  ;;  %p2418_p3 = scmp.lt.u32.totalorder %s2411_s19, %s3228_s3 }
  0x34   : > { %p2414_p9 = pnand %p2412_p6, %p2684_p0 }
  0x36   : > { %p2415_p2 = pneg %p2414_p9 }
  0x38   : > { %p2420_p4 = pnand %p2418_p3, %p2415_p2 }
  0x3a   : > { %2423 = shalt.err (!%p2420_p4)
}
  0x3b   : > { %s2424_s12 = scalar_lea.vmem %s2672_s15, 2048  ;;  %p2432_p13 = scmp.lt.s32.totalorder %s2672_s15, %s2672_s15 }
  0x3c   : > { %p2425_p7 = scmp.ne.s32.totalorder %s2672_s15, %s2424_s12  ;;  %p2433_p1 = scmp.lt.s32.totalorder %s2424_s12, %s2424_s12 }
  0x3e   : > { %p2427_p8 = pnand %p2425_p7, %p2684_p0  ;;  %p2434_p6 = por %p2433_p1, %p2432_p13 }
  0x40   : > { %p2428_p11 = pneg %p2427_p8 }
  0x42   : > { %p2435_p9 = pnand %p2434_p6, %p2428_p11 }
  0x44   : > { %2438 = shalt.err (!%p2435_p9)
}
  0x45   : > { %2194 = dma.hbm_to_vmem [thread:$0]  (!%p2668_p12), %s3228_s3, 2048, %s2672_s15, [#allocation3], %s2542_s24, %s2542_s24, %s2543_s26  }
  0x46   : > { %s2439_s25 = scalar_lea.hbm %s3232_s7, 2048 }
  0x47   : > { %p2440_p2 = scmp.ne.s32.totalorder %s3232_s7, %s2439_s25  ;;  %p2446_p7 = scmp.lt.u32.totalorder %s2439_s25, %s3232_s7 }
  0x49   : > { %p2442_p3 = pnand %p2440_p2, %p2684_p0 }
  0x4b   : > { %p2443_p4 = pneg %p2442_p3 }
  0x4d   : > { %p2448_p8 = pnand %p2446_p7, %p2443_p4 }
  0x4f   : > { %2451 = shalt.err (!%p2448_p8)
}
  0x50   : > { %s2452_s12 = scalar_lea.vmem %s344_s22, 2048  ;;  %p2460_p6 = scmp.lt.s32.totalorder %s344_s22, %s344_s22 }
  0x51   : > { %p2453_p11 = scmp.ne.s32.totalorder %s344_s22, %s2452_s12  ;;  %p2461_p9 = scmp.lt.s32.totalorder %s2452_s12, %s2452_s12 }
  0x53   : > { %p2455_p13 = pnand %p2453_p11, %p2684_p0  ;;  %p2462_p5 = por %p2461_p9, %p2460_p6 }
  0x55   : > { %p2456_p1 = pneg %p2455_p13 }
  0x57   : > { %p2463_p10 = pnand %p2462_p5, %p2456_p1 }
  0x59   : > { %2466 = shalt.err (!%p2463_p10)
}
  0x5a   : > { %2200 = dma.hbm_to_vmem [thread:$0]  (!%p2668_p12), %s3232_s7, 2048, %s344_s22, [#allocation6], %s2542_s24, %s2542_s24, %s2543_s26  }
  0x5b   : > { %p3259_p2 = scmp.ne.s32.totalorder %s3256_s29, 0 }
  0x5c   : > { %p3260_p0 = scmp.eq.s32.totalorder (!%p3259_p2), %s2630_s21, 0 }
  0x5d   : > { %377 = sbr.rel (%p3259_p2) target bundleno = 1245 (0x4dd), region = 64 }
  0x64   : > { %2512 = dma.done.wait (%p3260_p0), [#allocation3], 2048   ;;  %p3261_p3 = pmov %p3260_p0 }
  0x65   : > { %p3262_p5 = pmov %p3260_p0 }
  0x66   : > { %2514 = vsyncadd (%p3261_p3), [#allocation3], 4294965248 }
  0x67   : > { %2516 = dma.done.wait (%p3262_p5), [#allocation6], 4096   ;;  %p3263_p10 = pmov %p3260_p0 }
  0x68   : > { %s1754_s23 = sshll.u32 %s2630_s21, 4  ;;  %v2544_v0 = vmov 0   ;;  %v654_v6 = vld [vmem:[#allocation2] sm:$0xff]  ;;  %v655_v7 = vld [vmem:[#allocation2 + $0x8] sm:$0xff]  ;;  %v656_v10 = vld [vmem:[#allocation2 + $0x10] sm:$0xff]  ;;  %s422_s14 = sand.u32 1, %s2529_s18  }
  0x69   : > { %2518 = vsyncadd (%p3263_p10), [#allocation6], 4294963200  ;;  %2254 = vset.pattern.permute.xlu1 %v2544_v0  ;;  %2253 = vset.pattern.permute.xlu0 %v2544_v0  ;;  %p426_p12 = scmp.lt.s32.totalorder %s1754_s23, 31  ;;  %v2033_v9 = vpack.c.bf16 %v655_v7, %v654_v6  ;;  %v657_v11 = vld [vmem:[#allocation2 + $0x18] sm:$0xff]  ;;  %v658_v13 = vld [vmem:[#allocation2 + $0x20] sm:$0xff]  ;;  %s1753_s12 = sshll.u32 %s422_s14, 8 }
  0x6a   : > { %v2037_v12 = vpack.c.bf16 %v657_v11, %v656_v10  ;;  %v659_v14 = vld [vmem:[#allocation2 + $0x28] sm:$0xff]  ;;  %v660_v18 = vld [vmem:[#allocation2 + $0x30] sm:$0xff]  ;;  %v661_v19 = vld [vmem:[#allocation2 + $0x38] sm:$0xff]  ;;  %s3109_s15 = scalar_lea.vmem [#allocation8], %s1753_s12  ;;  %s1768_s11 = sshll.u32 %s2630_s21, 12 }
  0x6b   : > { %s3276_s23 = smov (!%p426_p12, %s1754_s23), 31  ;;  %2034 = vmatprep.subr.bf16.mxu0 %v2033_v9  ;;  %v2041_v17 = vpack.c.bf16 %v659_v14, %v658_v13  ;;  %v2045_v22 = vpack.c.bf16 %v661_v19, %v660_v18  ;;  %v662_v23 = vld [vmem:[#allocation2 + $0x40] sm:$0xff]  ;;  %v663_v24 = vld [vmem:[#allocation2 + $0x48] sm:$0xff]  ;;  %v664_v28 = vld [vmem:[#allocation2 + $0x50] sm:$0xff]  ;;  %s3264_s22 = sld [smem:[#allocation18_spill]] }
  0x6c   : > { %s1755_s29 = sshll.u32 %s3276_s23, 3  ;;  %2036 = vmatpush3.bf16.msra.mxu0 %v2033_v9  ;;  %v2049_v27 = vpack.c.bf16 %v663_v24, %v662_v23  ;;  %v665_v29 = vld [vmem:[#allocation2 + $0x58] sm:$0xff]  ;;  %v666_v33 = vld [vmem:[#allocation2 + $0x60] sm:$0xff]  ;;  %v667_v34 = vld [vmem:[#allocation2 + $0x68] sm:$0xff]  ;;  %s1650_s23 = sshll.u32 %s3109_s15, 4  ;;  %s3177_s23 = int_to_ptr.vmem [resolvable:$true] %s1650_s23 }
  0x6d   : > { %s2770_s24 = scalar_lea.vmem %s3225_s0, %s1755_s29  ;;  %2038 = vmatprep.subr.bf16.mxu0 %v2037_v12  ;;  %v2053_v32 = vpack.c.bf16 %v665_v29, %v664_v28  ;;  %v2057_v37 = vpack.c.bf16 %v667_v34, %v666_v33  ;;  %v668_v38 = vld [vmem:[#allocation2 + $0x70] sm:$0xff]  ;;  %v669_v39 = vld [vmem:[#allocation2 + $0x78] sm:$0xff]  ;;  %v902_v41 = vld [vmem:[#allocation5] sm:$0xff]  ;;  %s3184_s21 = scalar_lea.sflag [#allocation4], %s422_s14 }
  0x6e   : > { %v434_v1 = vld [vmem:[%s2770_s24 + $0x10] sm:$0xff]  ;;  %v432_v2 = vld [vmem:[%s2770_s24] sm:$0xff]  ;;  %v435_v3 = vld [vmem:[%s2770_s24 + $0x18] sm:$0xff]  ;;  %v2061_v40 = vpack.c.bf16 %v669_v39, %v668_v38  ;;  %s2467_s26 = scalar_lea.vmem %s3177_s23, 4096  ;;  %p3265_p7 = scmp.ne.s32.totalorder %s3253_s27, 0 }
  0x6f   : > { %461 = vperm.xlu1 %2254, %v434_v1   ;;  %451 = vperm.xlu0 %2253, %v432_v2   ;;  %v433_v4 = vld [vmem:[%s2770_s24 + $0x8] sm:$0xff]  ;;  %v436_v8 = vld [vmem:[%s2770_s24 + $0x20] sm:$0xff]  ;;  %v439_v15 = vld [vmem:[%s2770_s24 + $0x38] sm:$0xff]  ;;  %p2468_p4 = scmp.ne.s32.totalorder %s3177_s23, %s2467_s26  ;;  %s2546_s17 = smov [#allocation8]  }
  0x70   : > { %v437_v5 = vld [vmem:[%s2770_s24 + $0x28] sm:$0xff]  ;;  %v438_v16 = vld [vmem:[%s2770_s24 + $0x30] sm:$0xff]  ;;  %v440_v21 = vld [vmem:[%s2770_s24 + $0x40] sm:$0xff]  ;;  %2040 = vmatpush3.bf16.msra.mxu0 %v2037_v12  ;;  %s2471_s20 = sshll.u32 %s2546_s17, 4  ;;  %s2472_s20 = int_to_ptr.vmem [resolvable:$false] %s2471_s20 }
  0x71   : > { %v441_v20 = vld [vmem:[%s2770_s24 + $0x48] sm:$0xff]  ;;  %2042 = vmatprep.subr.bf16.mxu0 %v2041_v17  ;;  %v443_v25 = vld [vmem:[%s2770_s24 + $0x58] sm:$0xff]  ;;  %v442_v26 = vld [vmem:[%s2770_s24 + $0x50] sm:$0xff]  ;;  %p2469_p8 = pnand %p2468_p4, %p3265_p7  ;;  %s2473_s28 = scalar_lea.vmem %s2472_s20, 8192 }
  0x72   : > { %v445_v30 = vld [vmem:[%s2770_s24 + $0x68] sm:$0xff]  ;;  %v444_v31 = vld [vmem:[%s2770_s24 + $0x60] sm:$0xff]  ;;  %v447_v35 = vld [vmem:[%s2770_s24 + $0x78] sm:$0xff]  ;;  %p2474_p13 = scmp.lt.s32.totalorder %s3177_s23, %s2472_s20  ;;  %p2475_p1 = scmp.lt.s32.totalorder %s2473_s28, %s2467_s26 }
  0x73   : > { %466 = vperm.xlu1 %2254, %v435_v3   ;;  %456 = vperm.xlu0 %2253, %v433_v4   ;;  %v446_v36 = vld [vmem:[%s2770_s24 + $0x70] sm:$0xff]  ;;  %v903_v42 = vld [vmem:[#allocation5 + $0x8] sm:$0xff]  ;;  %v905_v45 = vld [vmem:[#allocation5 + $0x18] sm:$0xff]  ;;  %s3175_s24 = scalar_lea.hbm %s3264_s22, %s1768_s11  ;;  %p2470_p11 = pneg %p2469_p8 }
  0x74   : > { %2044 = vmatpush3.bf16.msra.mxu0 %v2041_v17  ;;  %v904_v43 = vld [vmem:[#allocation5 + $0x10] sm:$0xff]  ;;  %v2065_v44 = vpack.c.bf16 %v903_v42, %v902_v41  ;;  %v906_v47 = vld [vmem:[#allocation5 + $0x20] sm:$0xff]  ;;  %v907_v48 = vld [vmem:[#allocation5 + $0x28] sm:$0xff]  ;;  %p2476_p6 = por %p2475_p1, %p2474_p13 }
  0x75   : > { %2046 = vmatprep.subr.bf16.mxu0 %v2045_v22  ;;  %v2069_v46 = vpack.c.bf16 %v905_v45, %v904_v43  ;;  %v2073_v49 = vpack.c.bf16 %v907_v48, %v906_v47  ;;  %v2791_v50 = vld [vmem:[%s3226_s1] ss:$0 sm:$0xff] }
  0x76   : > { %2066 = vmatprep.subr.bf16.mxu1 %v2065_v44  ;;  %v2796_v51 = vld [vmem:[%s3227_s2] ss:$0 sm:$0xff]  ;;  %p2477_p9 = pnand %p2476_p6, %p2470_p11 }
  0x77   : > { %476 = vperm.xlu1 %2254, %v437_v5   ;;  %471 = vperm.xlu0 %2253, %v436_v8  }
  0x78   : > { %2048 = vmatpush3.bf16.msra.mxu0 %v2045_v22  ;;  %2068 = vmatpush3.bf16.msra.mxu1 %v2065_v44 }
  0x79   : > { %2050 = vmatprep.subr.bf16.mxu0 %v2049_v27  ;;  %2070 = vmatprep.subr.bf16.mxu1 %v2069_v46 }
  0x7b   : > { %486 = vperm.xlu1 %2254, %v439_v15   ;;  %481 = vperm.xlu0 %2253, %v438_v16  }
  0x7c   : > { %2052 = vmatpush3.bf16.msra.mxu0 %v2049_v27  ;;  %2072 = vmatpush3.bf16.msra.mxu1 %v2069_v46 }
  0x7d   : > { %2054 = vmatprep.subr.bf16.mxu0 %v2053_v32  ;;  %2074 = vmatprep.subr.bf16.mxu1 %v2073_v49 }
  0x7f   : > { %496 = vperm.xlu1 %2254, %v441_v20   ;;  %491 = vperm.xlu0 %2253, %v440_v21  }
  0x80   : > { %2056 = vmatpush3.bf16.msra.mxu0 %v2053_v32  ;;  %2076 = vmatpush3.bf16.msra.mxu1 %v2073_v49 }
  0x81   : > { %2058 = vmatprep.subr.bf16.mxu0 %v2057_v37 }
  0x83   : > { %506 = vperm.xlu1 %2254, %v443_v25   ;;  %501 = vperm.xlu0 %2253, %v442_v26  }
  0x84   : > { %2060 = vmatpush3.bf16.msra.mxu0 %v2057_v37 }
  0x85   : > { %2062 = vmatprep.subr.bf16.mxu0 %v2061_v40 }
  0x87   : > { %516 = vperm.xlu1 %2254, %v445_v30   ;;  %511 = vperm.xlu0 %2253, %v444_v31  }
  0x88   : > { %2064 = vmatpush3.bf16.msra.mxu0 %v2061_v40 }
  0x8b   : > { %526 = vperm.xlu1 %2254, %v447_v35   ;;  %521 = vperm.xlu0 %2253, %v446_v36  }
  0xee   : > { %v462_v52 = vpop.permute.xlu1 %461  ;;  %v452_v53 = vpop.permute.xlu0 %451 }
  0xef   : > { %v537_v54 = vmul.f32 %v2791_v50, %v462_v52  ;;  %v535_v55 = vmul.f32 %v2791_v50, %v452_v53 }
  0xf1   : > { %v560_v56 = vadd.f32 %v2796_v51, %v537_v54  ;;  %v558_v57 = vadd.f32 %v2796_v51, %v535_v55 }
  0xf2   : > { %v467_v58 = vpop.permute.xlu1 %466  ;;  %v457_v59 = vpop.permute.xlu0 %456 }
  0xf3   : > { %v592_v60 = vmul.f32 0.70710677, %v560_v56  ;;  %v590_v61 = vmul.f32 0.70710677, %v558_v57  ;;  %v538_v62 = vmul.f32 %v2791_v50, %v467_v58  ;;  %v536_v63 = vmul.f32 %v2791_v50, %v457_v59 }
  0xf4   : > { %v574_v31 = vmul.f32 0.5, %v558_v57  ;;  %v576_v42 = vmul.f32 0.5, %v560_v56 }
  0xf5   : > { %2255 = verf.f32 %v592_v60  ;;  %v2805_v0 = vadd.f32 %v2796_v51, %v538_v62  ;;  %v559_v1 = vadd.f32 %v2796_v51, %v536_v63 }
  0xf6   : > { %v477_v2 = vpop.permute.xlu1 %476  ;;  %v472_v3 = vpop.permute.xlu0 %471  ;;  %2257 = verf.f32 %v590_v61 }
  0xf7   : > { %v593_v4 = vmul.f32 0.70710677, %v2805_v0  ;;  %v540_v5 = vmul.f32 %v2791_v50, %v477_v2  ;;  %v539_v6 = vmul.f32 %v2791_v50, %v472_v3  ;;  %v591_v7 = vmul.f32 0.70710677, %v559_v1 }
  0xf8   : > { %v575_v40 = vmul.f32 0.5, %v559_v1  ;;  %v577_v58 = vmul.f32 0.5, %v2805_v0 }
  0xf9   : > { %2259 = verf.f32 %v593_v4  ;;  %v2812_v8 = vadd.f32 %v2796_v51, %v540_v5  ;;  %v562_v9 = vadd.f32 %v2796_v51, %v539_v6 }
  0xfa   : > { %2261 = verf.f32 %v591_v7  ;;  %v487_v10 = vpop.permute.xlu1 %486  ;;  %v482_v11 = vpop.permute.xlu0 %481 }
  0xfb   : > { %v595_v12 = vmul.f32 0.70710677, %v2812_v8  ;;  %v594_v13 = vmul.f32 0.70710677, %v562_v9  ;;  %v542_v14 = vmul.f32 %v2791_v50, %v487_v10  ;;  %v541_v15 = vmul.f32 %v2791_v50, %v482_v11 }
  0xfc   : > { %v578_v62 = vmul.f32 0.5, %v562_v9 }
  0xfd   : > { %2263 = verf.f32 %v595_v12  ;;  %v2819_v16 = vadd.f32 %v2796_v51, %v542_v14  ;;  %v2822_v17 = vadd.f32 %v2796_v51, %v541_v15  ;;  %v579_v12 = vmul.f32 0.5, %v2812_v8 }
  0xfe   : > { %2265 = verf.f32 %v594_v13  ;;  %v497_v18 = vpop.permute.xlu1 %496  ;;  %v492_v19 = vpop.permute.xlu0 %491 }
  0xff   : > { %v2256_v20 = vpop.eup %2255  ;;  %v544_v21 = vmul.f32 %v2791_v50, %v497_v18  ;;  %v543_v22 = vmul.f32 %v2791_v50, %v492_v19  ;;  %v597_v24 = vmul.f32 0.70710677, %v2819_v16  ;;  %v596_v25 = vmul.f32 0.70710677, %v2822_v17 }
 0x100   : > { %v2258_v23 = vpop.eup %2257  ;;  %v624_v34 = vadd.f32 1.0, %v2256_v20  ;;  %v580_v18 = vmul.f32 0.5, %v2822_v17 }
 0x101   : > { %v2829_v26 = vadd.f32 %v2796_v51, %v544_v21  ;;  %v2832_v27 = vadd.f32 %v2796_v51, %v543_v22  ;;  %v622_v28 = vadd.f32 1.0, %v2258_v23  ;;  %2267 = verf.f32 %v597_v24 }
 0x102   : > { %v507_v29 = vpop.permute.xlu1 %506  ;;  %v502_v30 = vpop.permute.xlu0 %501  ;;  %2269 = verf.f32 %v596_v25  ;;  %v640_v57 = vmul.f32 %v624_v34, %v576_v42  ;;  %v581_v23 = vmul.f32 0.5, %v2819_v16 }
 0x103   : > { %v2260_v32 = vpop.eup %2259  ;;  %v599_v33 = vmul.f32 0.70710677, %v2829_v26  ;;  %v598_v36 = vmul.f32 0.70710677, %v2832_v27  ;;  %v546_v37 = vmul.f32 %v2791_v50, %v507_v29  ;;  %v545_v38 = vmul.f32 %v2791_v50, %v502_v30 }
 0x104   : > { %v2262_v35 = vpop.eup %2261  ;;  %v638_v39 = vmul.f32 %v622_v28, %v574_v31  ;;  %v625_v53 = vadd.f32 1.0, %v2260_v32  ;;  %v582_v8 = vmul.f32 0.5, %v2832_v27  ;;  %v583_v31 = vmul.f32 0.5, %v2829_v26 }
 0x105   : > { %2271 = verf.f32 %v599_v33  ;;  %v623_v41 = vadd.f32 1.0, %v2262_v35  ;;  %v2839_v43 = vadd.f32 %v2796_v51, %v546_v37  ;;  %v568_v44 = vadd.f32 %v2796_v51, %v545_v38 }
 0x106   : > { %2273 = verf.f32 %v598_v36  ;;  %1897 = vmatprep.mubr.f32.mxu0 %v638_v39  ;;  %v517_v45 = vpop.permute.xlu1 %516  ;;  %v512_v46 = vpop.permute.xlu0 %511  ;;  %v641_v3 = vmul.f32 %v625_v53, %v577_v58  ;;  %v911_v58 = vld [vmem:[#allocation5 + $0x48] sm:$0xff] }
 0x107   : > { %v2264_v47 = vpop.eup %2263  ;;  %v548_v48 = vmul.f32 %v2791_v50, %v517_v45  ;;  %v547_v49 = vmul.f32 %v2791_v50, %v512_v46  ;;  %v639_v52 = vmul.f32 %v623_v41, %v575_v40  ;;  %v601_v55 = vmul.f32 0.70710677, %v2839_v43 }
 0x108   : > { %v2266_v54 = vpop.eup %2265  ;;  %v600_v56 = vmul.f32 0.70710677, %v568_v44  ;;  %v627_v4 = vadd.f32 1.0, %v2264_v47  ;;  %v584_v32 = vmul.f32 0.5, %v568_v44  ;;  %v585_v37 = vmul.f32 0.5, %v2839_v43 }
 0x109   : > { %v2847_v59 = vadd.f32 %v2796_v51, %v548_v48  ;;  %v570_v60 = vadd.f32 %v2796_v51, %v547_v49  ;;  %1898 = vmatmul.mubr.f32.vlgmr.msra.gmra.mrb[0].mxu0 %v639_v52  ;;  %v626_v61 = vadd.f32 1.0, %v2266_v54  ;;  %2275 = verf.f32 %v601_v55  ;;  %v908_v54 = vld [vmem:[#allocation5 + $0x30] sm:$0xff]  ;;  %v909_v55 = vld [vmem:[#allocation5 + $0x38] sm:$0xff] }
 0x10a   : > { %1900 = vmatprep.mubr.f32.mxu0 %v640_v57  ;;  %v527_v63 = vpop.permute.xlu1 %526  ;;  %v522_v1 = vpop.permute.xlu0 %521  ;;  %2277 = verf.f32 %v600_v56  ;;  %v643_v19 = vmul.f32 %v627_v4, %v579_v12  ;;  %v2077_v56 = vpack.c.bf16 %v909_v55, %v908_v54  ;;  %v910_v57 = vld [vmem:[#allocation5 + $0x40] sm:$0xff]  ;;  %v917_v4 = vld [vmem:[#allocation5 + $0x78] sm:$0xff] }
 0x10b   : > { %v603_v2 = vmul.f32 0.70710677, %v2847_v59  ;;  %v2268_v5 = vpop.eup %2267  ;;  %v602_v6 = vmul.f32 0.70710677, %v570_v60  ;;  %v550_v0 = vmul.f32 %v2791_v50, %v527_v63  ;;  %v549_v7 = vmul.f32 %v2791_v50, %v522_v1  ;;  %v914_v63 = vld [vmem:[#allocation5 + $0x60] sm:$0xff]  ;;  %v915_v1 = vld [vmem:[#allocation5 + $0x68] sm:$0xff] }
 0x10c   : > { %v642_v10 = vmul.f32 %v626_v61, %v578_v62  ;;  %v2270_v11 = vpop.eup %2269  ;;  %v629_v20 = vadd.f32 1.0, %v2268_v5  ;;  %v586_v38 = vmul.f32 0.5, %v570_v60  ;;  %v587_v44 = vmul.f32 0.5, %v2847_v59  ;;  %2078 = vmatprep.subr.bf16.mxu1 %v2077_v56  ;;  %v912_v60 = vld [vmem:[#allocation5 + $0x50] sm:$0xff]  ;;  %v913_v61 = vld [vmem:[#allocation5 + $0x58] sm:$0xff] }
 0x10d   : > { %2279 = verf.f32 %v603_v2  ;;  %1901 = vmatmul.mubr.f32.gmra.mrb[2].mxu0 %v641_v3  ;;  %v573_v9 = vadd.f32 %v2796_v51, %v550_v0  ;;  %v572_v13 = vadd.f32 %v2796_v51, %v549_v7  ;;  %v628_v14 = vadd.f32 1.0, %v2270_v11  ;;  %2080 = vmatpush3.bf16.msra.mxu1 %v2077_v56  ;;  %v916_v3 = vld [vmem:[#allocation5 + $0x70] sm:$0xff]  ;;  %v1151_v0 = vld [vmem:[#allocation7 + $0x8] sm:$0xff]  ;;  %v1153_v11 = vld [vmem:[#allocation7 + $0x18] sm:$0xff] }
 0x10e   : > { %2281 = verf.f32 %v602_v6  ;;  %1903 = vmatprep.mubr.f32.mxu0 %v642_v10  ;;  %v645_v51 = vmul.f32 %v629_v20, %v581_v23  ;;  %v2081_v59 = vpack.c.bf16 %v911_v58, %v910_v57  ;;  %v2085_v62 = vpack.c.bf16 %v913_v61, %v912_v60  ;;  %v1150_v6 = vld [vmem:[#allocation7] sm:$0xff]  ;;  %v1152_v7 = vld [vmem:[#allocation7 + $0x10] sm:$0xff] }
 0x10f   : > { %v2272_v15 = vpop.eup %2271  ;;  %v605_v50 = vmul.f32 0.70710677, %v573_v9  ;;  %v604_v22 = vmul.f32 0.70710677, %v572_v13  ;;  %v644_v24 = vmul.f32 %v628_v14, %v580_v18  ;;  %v588_v46 = vmul.f32 0.5, %v572_v13  ;;  %v1155_v13 = vld [vmem:[#allocation7 + $0x28] sm:$0xff] }
 0x110   : > { %v2274_v21 = vpop.eup %2273  ;;  %v631_v29 = vadd.f32 1.0, %v2272_v15  ;;  %v589_v53 = vmul.f32 0.5, %v573_v9  ;;  %2082 = vmatprep.subr.bf16.mxu1 %v2081_v59  ;;  %v2089_v2 = vpack.c.bf16 %v915_v1, %v914_v63  ;;  %v2093_v5 = vpack.c.bf16 %v917_v4, %v916_v3  ;;  %v1154_v9 = vld [vmem:[#allocation7 + $0x20] sm:$0xff] }
 0x111   : > { %1904 = vmatmul.mubr.f32.gmra.mrb[4].mxu0 %v643_v19  ;;  %v630_v25 = vadd.f32 1.0, %v2274_v21  ;;  %2283 = verf.f32 %v605_v50  ;;  %2084 = vmatpush3.bf16.msra.mxu1 %v2081_v59  ;;  %v2097_v10 = vpack.c.bf16 %v1151_v0, %v1150_v6  ;;  %v2101_v12 = vpack.c.bf16 %v1153_v11, %v1152_v7  ;;  %v2865_v15 = vld [vmem:[%s3229_s4] ss:$0 sm:$0xff] }
 0x112   : > { %2285 = verf.f32 %v604_v22  ;;  %1906 = vmatprep.mubr.f32.mxu0 %v644_v24  ;;  %v647_v34 = vmul.f32 %v631_v29, %v583_v31  ;;  %2086 = vmatprep.subr.bf16.mxu1 %v2085_v62  ;;  %v2105_v14 = vpack.c.bf16 %v1155_v13, %v1154_v9 }
 0x113   : > { %v646_v28 = vmul.f32 %v630_v25, %v582_v8  ;;  %v2276_v30 = vpop.eup %2275  ;;  %2098 = vmatprep.subr.bf16.mxu0 %v2097_v10 }
 0x114   : > { %v2278_v17 = vpop.eup %2277  ;;  %v633_v27 = vadd.f32 1.0, %v2276_v30  ;;  %2100 = vmatpush3.bf16.msra.mxu0 %v2097_v10 }
 0x115   : > { %1907 = vmatmul.mubr.f32.gmra.mrb[6].mxu0 %v645_v51  ;;  %v632_v33 = vadd.f32 1.0, %v2278_v17  ;;  %2088 = vmatpush3.bf16.msra.mxu1 %v2085_v62 }
 0x116   : > { %1909 = vmatprep.mubr.f32.mxu0 %v646_v28  ;;  %v649_v40 = vmul.f32 %v633_v27, %v585_v37  ;;  %2090 = vmatprep.subr.bf16.mxu1 %v2089_v2 }
 0x117   : > { %v2280_v16 = vpop.eup %2279  ;;  %v648_v36 = vmul.f32 %v632_v33, %v584_v32  ;;  %2102 = vmatprep.subr.bf16.mxu0 %v2101_v12 }
 0x118   : > { %v2282_v35 = vpop.eup %2281  ;;  %v635_v42 = vadd.f32 1.0, %v2280_v16  ;;  %2104 = vmatpush3.bf16.msra.mxu0 %v2101_v12 }
 0x119   : > { %1910 = vmatmul.mubr.f32.gmra.mrb[8].mxu0 %v647_v34  ;;  %v634_v39 = vadd.f32 1.0, %v2282_v35  ;;  %2092 = vmatpush3.bf16.msra.mxu1 %v2089_v2 }
 0x11a   : > { %1912 = vmatprep.mubr.f32.mxu0 %v648_v36  ;;  %v651_v48 = vmul.f32 %v635_v42, %v587_v44  ;;  %2094 = vmatprep.subr.bf16.mxu1 %v2093_v5 }
 0x11b   : > { %v650_v41 = vmul.f32 %v634_v39, %v586_v38  ;;  %v2284_v45 = vpop.eup %2283  ;;  %2106 = vmatprep.subr.bf16.mxu0 %v2105_v14 }
 0x11c   : > { %v2286_v26 = vpop.eup %2285  ;;  %v637_v49 = vadd.f32 1.0, %v2284_v45  ;;  %2108 = vmatpush3.bf16.msra.mxu0 %v2105_v14 }
 0x11d   : > { %1913 = vmatmul.mubr.f32.gmra.mrb[10].mxu0 %v649_v40  ;;  %v636_v47 = vadd.f32 1.0, %v2286_v26  ;;  %2096 = vmatpush3.bf16.msra.mxu1 %v2093_v5 }
 0x11e   : > { %1915 = vmatprep.mubr.f32.mxu0 %v650_v41  ;;  %v653_v43 = vmul.f32 %v637_v49, %v589_v53 }
 0x11f   : > { %v652_v52 = vmul.f32 %v636_v47, %v588_v46 }
 0x121   : > { %1916 = vmatmul.mubr.f32.gmra.mrb[12].mxu0 %v651_v48 }
 0x122   : > { %1918 = vmatprep.mubr.f32.mxu0 %v652_v52 }
 0x125   : > { %1919 = vmatmul.mubr.f32.gmra.mrb[14].mxu0 %v653_v43 }
 0x1dc   : > { %v1899_v18 = vpop.f32.mrb[0].mxu0 }
 0x1dd   : > { %v749_v19 = vadd.f32 %v1899_v18, %v2865_v15  ;;  %v743_v20 = vpop.f32.mrb[1].mxu0 }
 0x1de   : > { %v744_v21 = vadd.f32 %v2865_v15, %v743_v20 }
 0x1df   : > { %v839_v50 = vmul.f32 0.70710677, %v749_v19  ;;  %v823_v46 = vmul.f32 0.5, %v749_v19 }
 0x1e0   : > { %v838_v22 = vmul.f32 0.70710677, %v744_v21  ;;  %v1902_v23 = vpop.f32.mrb[2].mxu0  ;;  %v822_v26 = vmul.f32 0.5, %v744_v21 }
 0x1e1   : > { %2287 = verf.f32 %v839_v50  ;;  %v759_v8 = vadd.f32 %v1902_v23, %v2865_v15  ;;  %v753_v24 = vpop.f32.mrb[3].mxu0 }
 0x1e2   : > { %2289 = verf.f32 %v838_v22  ;;  %v754_v25 = vadd.f32 %v2865_v15, %v753_v24 }
 0x1e3   : > { %v841_v51 = vmul.f32 0.70710677, %v759_v8  ;;  %v825_v61 = vmul.f32 0.5, %v759_v8 }
 0x1e4   : > { %v840_v28 = vmul.f32 0.70710677, %v754_v25  ;;  %v1905_v29 = vpop.f32.mrb[4].mxu0  ;;  %v824_v57 = vmul.f32 0.5, %v754_v25 }
 0x1e5   : > { %2291 = verf.f32 %v841_v51  ;;  %v769_v30 = vadd.f32 %v1905_v29, %v2865_v15  ;;  %v763_v17 = vpop.f32.mrb[5].mxu0 }
 0x1e6   : > { %2293 = verf.f32 %v840_v28  ;;  %v764_v31 = vadd.f32 %v2865_v15, %v763_v17 }
 0x1e7   : > { %v843_v32 = vmul.f32 0.70710677, %v769_v30  ;;  %v827_v9 = vmul.f32 0.5, %v769_v30 }
 0x1e8   : > { %v842_v33 = vmul.f32 0.70710677, %v764_v31  ;;  %v1908_v16 = vpop.f32.mrb[6].mxu0  ;;  %v826_v7 = vmul.f32 0.5, %v764_v31 }
 0x1e9   : > { %2295 = verf.f32 %v843_v32  ;;  %v2874_v34 = vadd.f32 %v1908_v16, %v2865_v15  ;;  %v773_v27 = vpop.f32.mrb[7].mxu0 }
 0x1ea   : > { %2297 = verf.f32 %v842_v33  ;;  %v774_v35 = vadd.f32 %v2865_v15, %v773_v27 }
 0x1eb   : > { %v2288_v36 = vpop.eup %2287  ;;  %v845_v37 = vmul.f32 0.70710677, %v2874_v34  ;;  %v829_v28 = vmul.f32 0.5, %v2874_v34 }
 0x1ec   : > { %v2290_v38 = vpop.eup %2289  ;;  %v871_v39 = vadd.f32 1.0, %v2288_v36  ;;  %v844_v40 = vmul.f32 0.70710677, %v774_v35  ;;  %v1911_v41 = vpop.f32.mrb[8].mxu0  ;;  %v828_v8 = vmul.f32 0.5, %v774_v35 }
 0x1ed   : > { %2299 = verf.f32 %v845_v37  ;;  %v2879_v42 = vadd.f32 %v1911_v41, %v2865_v15  ;;  %v783_v45 = vpop.f32.mrb[9].mxu0  ;;  %v870_v44 = vadd.f32 1.0, %v2290_v38 }
 0x1ee   : > { %2301 = verf.f32 %v844_v40  ;;  %v784_v47 = vadd.f32 %v2865_v15, %v783_v45  ;;  %v887_v56 = vmul.f32 %v871_v39, %v823_v46 }
 0x1ef   : > { %v2292_v48 = vpop.eup %2291  ;;  %v847_v49 = vmul.f32 0.70710677, %v2879_v42  ;;  %v886_v52 = vmul.f32 %v870_v44, %v822_v26  ;;  %v831_v37 = vmul.f32 0.5, %v2879_v42 }
 0x1f0   : > { %v2294_v53 = vpop.eup %2293  ;;  %v873_v43 = vadd.f32 1.0, %v2292_v48  ;;  %v846_v54 = vmul.f32 0.70710677, %v784_v47  ;;  %v1914_v55 = vpop.f32.mrb[10].mxu0  ;;  %v830_v35 = vmul.f32 0.5, %v784_v47 }
 0x1f1   : > { %v872_v58 = vadd.f32 1.0, %v2294_v53  ;;  %2303 = verf.f32 %v847_v49  ;;  %v2884_v59 = vadd.f32 %v1914_v55, %v2865_v15  ;;  %v793_v60 = vpop.f32.mrb[11].mxu0  ;;  %1953 = vmatprep.mubr.f32.mxu1 %v886_v52 }
 0x1f2   : > { %2305 = verf.f32 %v846_v54  ;;  %v794_v62 = vadd.f32 %v2865_v15, %v793_v60  ;;  %1954 = vmatmul.mubr.f32.vlgmr.msra.gmra.mrb[0].mxu1 %v887_v56  ;;  %v889_v0 = vmul.f32 %v873_v43, %v825_v61 }
 0x1f3   : > { %v2296_v63 = vpop.eup %2295  ;;  %v849_v1 = vmul.f32 0.70710677, %v2884_v59  ;;  %v888_v2 = vmul.f32 %v872_v58, %v824_v57  ;;  %v833_v26 = vmul.f32 0.5, %v2884_v59 }
 0x1f4   : > { %v2298_v3 = vpop.eup %2297  ;;  %v875_v4 = vadd.f32 1.0, %v2296_v63  ;;  %v848_v5 = vmul.f32 0.70710677, %v794_v62  ;;  %v1917_v6 = vpop.f32.mrb[12].mxu0  ;;  %v832_v41 = vmul.f32 0.5, %v794_v62  ;;  %v1156_v63 = vld [vmem:[#allocation7 + $0x30] sm:$0xff] }
 0x1f5   : > { %v874_v10 = vadd.f32 1.0, %v2298_v3  ;;  %2307 = verf.f32 %v849_v1  ;;  %v809_v11 = vadd.f32 %v1917_v6, %v2865_v15  ;;  %v803_v12 = vpop.f32.mrb[13].mxu0  ;;  %1956 = vmatprep.mubr.f32.mxu1 %v888_v2  ;;  %v1157_v1 = vld [vmem:[#allocation7 + $0x38] sm:$0xff]  ;;  %v1158_v3 = vld [vmem:[#allocation7 + $0x40] sm:$0xff]  ;;  %v1160_v6 = vld [vmem:[#allocation7 + $0x50] sm:$0xff] }
 0x1f6   : > { %2309 = verf.f32 %v848_v5  ;;  %v804_v13 = vadd.f32 %v2865_v15, %v803_v12  ;;  %1957 = vmatmul.mubr.f32.gmra.mrb[2].mxu1 %v889_v0  ;;  %v891_v23 = vmul.f32 %v875_v4, %v827_v9  ;;  %v2109_v2 = vpack.c.bf16 %v1157_v1, %v1156_v63  ;;  %v1159_v4 = vld [vmem:[#allocation7 + $0x48] sm:$0xff]  ;;  %v1161_v0 = vld [vmem:[#allocation7 + $0x58] sm:$0xff]  ;;  %v1164_v9 = vld [vmem:[#allocation7 + $0x70] sm:$0xff] }
 0x1f7   : > { %v2300_v14 = vpop.eup %2299  ;;  %v851_v18 = vmul.f32 0.70710677, %v809_v11  ;;  %v890_v19 = vmul.f32 %v874_v10, %v826_v7  ;;  %v835_v53 = vmul.f32 0.5, %v809_v11  ;;  %v2113_v5 = vpack.c.bf16 %v1159_v4, %v1158_v3  ;;  %v1162_v10 = vld [vmem:[#allocation7 + $0x60] sm:$0xff]  ;;  %v1163_v11 = vld [vmem:[#allocation7 + $0x68] sm:$0xff] }
 0x1f8   : > { %v2302_v20 = vpop.eup %2301  ;;  %v877_v21 = vadd.f32 1.0, %v2300_v14  ;;  %v850_v50 = vmul.f32 0.70710677, %v804_v13  ;;  %v1920_v22 = vpop.f32.mrb[14].mxu0  ;;  %v834_v52 = vmul.f32 0.5, %v804_v13  ;;  %2110 = vmatprep.subr.bf16.mxu0 %v2109_v2  ;;  %v2117_v7 = vpack.c.bf16 %v1161_v0, %v1160_v6  ;;  %v1165_v13 = vld [vmem:[#allocation7 + $0x78] sm:$0xff] }
 0x1f9   : > { %v876_v24 = vadd.f32 1.0, %v2302_v20  ;;  %2311 = verf.f32 %v851_v18  ;;  %v819_v25 = vadd.f32 %v1920_v22, %v2865_v15  ;;  %v813_v51 = vpop.f32.mrb[15].mxu0  ;;  %1959 = vmatprep.mubr.f32.mxu1 %v890_v19  ;;  %2112 = vmatpush3.bf16.msra.mxu0 %v2109_v2  ;;  %v2121_v12 = vpack.c.bf16 %v1163_v11, %v1162_v10  ;;  %v1399_v18 = vld [vmem:[%s3234_s9 + $0x8] sm:$0xff]  ;;  %v1401_v19 = vld [vmem:[%s3234_s9 + $0x18] sm:$0xff]  ;;  %v1398_v20 = vld [vmem:[%s3234_s9] sm:$0xff] }
 0x1fa   : > { %2313 = verf.f32 %v850_v50  ;;  %v814_v29 = vadd.f32 %v2865_v15, %v813_v51  ;;  %1960 = vmatmul.mubr.f32.gmra.mrb[4].mxu1 %v891_v23  ;;  %v893_v27 = vmul.f32 %v877_v21, %v829_v28  ;;  %2114 = vmatprep.subr.bf16.mxu0 %v2113_v5  ;;  %v2125_v14 = vpack.c.bf16 %v1165_v13, %v1164_v9  ;;  %v1400_v50 = vld [vmem:[%s3234_s9 + $0x10] sm:$0xff]  ;;  %v1403_v22 = vld [vmem:[%s3234_s9 + $0x28] sm:$0xff]  ;;  %v1405_v23 = vld [vmem:[%s3234_s9 + $0x38] sm:$0xff] }
 0x1fb   : > { %v2304_v30 = vpop.eup %2303  ;;  %v853_v17 = vmul.f32 0.70710677, %v819_v25  ;;  %v892_v31 = vmul.f32 %v876_v24, %v828_v8  ;;  %v837_v59 = vmul.f32 0.5, %v819_v25  ;;  %v2129_v21 = vpack.c.bf16 %v1401_v19, %v1399_v18  ;;  %v1402_v25 = vld [vmem:[%s3234_s9 + $0x20] sm:$0xff]  ;;  %v1404_v51 = vld [vmem:[%s3234_s9 + $0x30] sm:$0xff]  ;;  %v1407_v28 = vld [vmem:[%s3234_s9 + $0x48] sm:$0xff] }
 0x1fc   : > { %v2306_v32 = vpop.eup %2305  ;;  %v879_v33 = vadd.f32 1.0, %v2304_v30  ;;  %v852_v16 = vmul.f32 0.70710677, %v814_v29  ;;  %v836_v58 = vmul.f32 0.5, %v814_v29  ;;  %v2913_v8 = vpack.c.bf16 %v1400_v50, %v1398_v20  ;;  %v1409_v29 = vld [vmem:[%s3234_s9 + $0x58] sm:$0xff] }
 0x1fd   : > { %v878_v36 = vadd.f32 1.0, %v2306_v32  ;;  %2315 = verf.f32 %v853_v17  ;;  %1962 = vmatprep.mubr.f32.mxu1 %v892_v31  ;;  %2116 = vmatpush3.bf16.msra.mxu0 %v2113_v5  ;;  %v2915_v24 = vpack.c.bf16 %v1405_v23, %v1403_v22  ;;  %v2931_v30 = vpack.c.bf16 %v1404_v51, %v1402_v25  ;;  %v1406_v31 = vld [vmem:[%s3234_s9 + $0x40] sm:$0xff]  ;;  %v1408_v32 = vld [vmem:[%s3234_s9 + $0x50] sm:$0xff] }
 0x1fe   : > { %2317 = verf.f32 %v852_v16  ;;  %1963 = vmatmul.mubr.f32.gmra.mrb[6].mxu1 %v893_v27  ;;  %v895_v40 = vmul.f32 %v879_v33, %v831_v37  ;;  %2118 = vmatprep.subr.bf16.mxu0 %v2117_v7  ;;  %v2933_v17 = vpack.c.bf16 %v1409_v29, %v1407_v28  ;;  %v2943_v33 = vpack.c.bf16 %v1408_v32, %v1406_v31  ;;  %v2949_v16 = vld [vmem:[%s3231_s6] ss:$0 sm:$0xff] }
 0x1ff   : > { %v2308_v34 = vpop.eup %2307  ;;  %v894_v38 = vmul.f32 %v878_v36, %v830_v35  ;;  %2161 = vmatprep.subr.bf16.mxu1 %v2129_v21 }
 0x200   : > { %v2310_v39 = vpop.eup %2309  ;;  %v881_v15 = vadd.f32 1.0, %v2308_v34  ;;  %2169 = vmatpush1.bf16.msra.mxu1 %v2913_v8 }
 0x201   : > { %v880_v45 = vadd.f32 1.0, %v2310_v39  ;;  %1965 = vmatprep.mubr.f32.mxu1 %v894_v38  ;;  %2120 = vmatpush3.bf16.msra.mxu0 %v2117_v7 }
 0x202   : > { %1966 = vmatmul.mubr.f32.gmra.mrb[8].mxu1 %v895_v40  ;;  %v897_v49 = vmul.f32 %v881_v15, %v833_v26  ;;  %2122 = vmatprep.subr.bf16.mxu0 %v2121_v12 }
 0x203   : > { %v2312_v44 = vpop.eup %2311  ;;  %v896_v46 = vmul.f32 %v880_v45, %v832_v41  ;;  %2162 = vmatprep.subr.bf16.mxu1 %v2915_v24 }
 0x204   : > { %v2314_v47 = vpop.eup %2313  ;;  %v883_v48 = vadd.f32 1.0, %v2312_v44  ;;  %2170 = vmatpush1.bf16.msra.mxu1 %v2931_v30 }
 0x205   : > { %v882_v42 = vadd.f32 1.0, %v2314_v47  ;;  %1968 = vmatprep.mubr.f32.mxu1 %v896_v46  ;;  %2124 = vmatpush3.bf16.msra.mxu0 %v2121_v12 }
 0x206   : > { %1969 = vmatmul.mubr.f32.gmra.mrb[10].mxu1 %v897_v49  ;;  %v899_v57 = vmul.f32 %v883_v48, %v835_v53  ;;  %2126 = vmatprep.subr.bf16.mxu0 %v2125_v14 }
 0x207   : > { %v2316_v43 = vpop.eup %2315  ;;  %v898_v54 = vmul.f32 %v882_v42, %v834_v52  ;;  %2163 = vmatprep.subr.bf16.mxu1 %v2933_v17 }
 0x208   : > { %v2318_v55 = vpop.eup %2317  ;;  %v885_v56 = vadd.f32 1.0, %v2316_v43  ;;  %2171 = vmatpush1.bf16.msra.mxu1 %v2943_v33 }
 0x209   : > { %v884_v60 = vadd.f32 1.0, %v2318_v55  ;;  %1971 = vmatprep.mubr.f32.mxu1 %v898_v54  ;;  %2128 = vmatpush3.bf16.msra.mxu0 %v2125_v14 }
 0x20a   : > { %1972 = vmatmul.mubr.f32.gmra.mrb[12].mxu1 %v899_v57  ;;  %v901_v62 = vmul.f32 %v885_v56, %v837_v59  ;;  %2130 = vmatprep.subr.bf16.mxu0 %v2129_v21 }
 0x20b   : > { %v900_v61 = vmul.f32 %v884_v60, %v836_v58 }
 0x20d   : > { %1974 = vmatprep.mubr.f32.mxu1 %v900_v61 }
 0x20e   : > { %1975 = vmatmul.mubr.f32.gmra.mrb[14].mxu1 %v901_v62 }
 0x2c5   : > { %v1955_v27 = vpop.f32.mrb[0].mxu1 }
 0x2c6   : > { %v997_v35 = vadd.f32 %v1955_v27, %v2949_v16  ;;  %v991_v36 = vpop.f32.mrb[1].mxu1 }
 0x2c7   : > { %v992_v37 = vadd.f32 %v2949_v16, %v991_v36 }
 0x2c8   : > { %v1087_v34 = vmul.f32 0.70710677, %v997_v35  ;;  %v1071_v2 = vmul.f32 0.5, %v997_v35 }
 0x2c9   : > { %v1086_v38 = vmul.f32 0.70710677, %v992_v37  ;;  %v1958_v39 = vpop.f32.mrb[2].mxu1  ;;  %v1070_v61 = vmul.f32 0.5, %v992_v37 }
 0x2ca   : > { %2319 = verf.f32 %v1087_v34  ;;  %v1007_v15 = vadd.f32 %v1958_v39, %v2949_v16  ;;  %v1001_v40 = vpop.f32.mrb[3].mxu1 }
 0x2cb   : > { %2321 = verf.f32 %v1086_v38  ;;  %v1002_v41 = vadd.f32 %v2949_v16, %v1001_v40 }
 0x2cc   : > { %v1089_v45 = vmul.f32 0.70710677, %v1007_v15  ;;  %v1073_v19 = vmul.f32 0.5, %v1007_v15 }
 0x2cd   : > { %v1088_v26 = vmul.f32 0.70710677, %v1002_v41  ;;  %v1961_v44 = vpop.f32.mrb[4].mxu1  ;;  %v1072_v9 = vmul.f32 0.5, %v1002_v41 }
 0x2ce   : > { %2323 = verf.f32 %v1089_v45  ;;  %v1017_v46 = vadd.f32 %v1961_v44, %v2949_v16  ;;  %v1011_v47 = vpop.f32.mrb[5].mxu1 }
 0x2cf   : > { %2325 = verf.f32 %v1088_v26  ;;  %v1012_v48 = vadd.f32 %v2949_v16, %v1011_v47 }
 0x2d0   : > { %v1091_v49 = vmul.f32 0.70710677, %v1017_v46  ;;  %v1075_v36 = vmul.f32 0.5, %v1017_v46 }
 0x2d1   : > { %v1090_v52 = vmul.f32 0.70710677, %v1012_v48  ;;  %v1964_v42 = vpop.f32.mrb[6].mxu1  ;;  %v1074_v31 = vmul.f32 0.5, %v1012_v48 }
 0x2d2   : > { %2327 = verf.f32 %v1091_v49  ;;  %v2958_v53 = vadd.f32 %v1964_v42, %v2949_v16  ;;  %v1021_v43 = vpop.f32.mrb[7].mxu1 }
 0x2d3   : > { %2329 = verf.f32 %v1090_v52  ;;  %v1022_v54 = vadd.f32 %v2949_v16, %v1021_v43 }
 0x2d4   : > { %v2320_v55 = vpop.eup %2319  ;;  %v1093_v56 = vmul.f32 0.70710677, %v2958_v53  ;;  %v1077_v47 = vmul.f32 0.5, %v2958_v53 }
 0x2d5   : > { %v2322_v57 = vpop.eup %2321  ;;  %v1119_v58 = vadd.f32 1.0, %v2320_v55  ;;  %v1092_v60 = vmul.f32 0.70710677, %v1022_v54  ;;  %v1967_v59 = vpop.f32.mrb[8].mxu1  ;;  %v1076_v45 = vmul.f32 0.5, %v1022_v54 }
 0x2d6   : > { %v1118_v62 = vadd.f32 1.0, %v2322_v57  ;;  %2331 = verf.f32 %v1093_v56  ;;  %v2963_v63 = vadd.f32 %v1967_v59, %v2949_v16  ;;  %v1031_v1 = vpop.f32.mrb[9].mxu1 }
 0x2d7   : > { %2333 = verf.f32 %v1092_v60  ;;  %v2966_v3 = vadd.f32 %v2949_v16, %v1031_v1  ;;  %v1135_v7 = vmul.f32 %v1119_v58, %v1071_v2 }
 0x2d8   : > { %v2324_v4 = vpop.eup %2323  ;;  %v1095_v5 = vmul.f32 0.70710677, %v2963_v63  ;;  %v1134_v6 = vmul.f32 %v1118_v62, %v1070_v61  ;;  %v1079_v53 = vmul.f32 0.5, %v2963_v63 }
 0x2d9   : > { %v2326_v0 = vpop.eup %2325  ;;  %v1121_v10 = vadd.f32 1.0, %v2324_v4  ;;  %v1094_v11 = vmul.f32 0.70710677, %v2966_v3  ;;  %v1970_v12 = vpop.f32.mrb[10].mxu1  ;;  %v1078_v55 = vmul.f32 0.5, %v2966_v3 }
 0x2da   : > { %v1120_v13 = vadd.f32 1.0, %v2326_v0  ;;  %2335 = verf.f32 %v1095_v5  ;;  %v2971_v14 = vadd.f32 %v1970_v12, %v2949_v16  ;;  %v1041_v18 = vpop.f32.mrb[11].mxu1  ;;  %2009 = vmatprep.mubr.f32.mxu0 %v1134_v6 }
 0x2db   : > { %2337 = verf.f32 %v1094_v11  ;;  %v1042_v20 = vadd.f32 %v2949_v16, %v1041_v18  ;;  %2010 = vmatmul.mubr.f32.vlgmr.msra.gmra.mrb[16].mxu0 %v1135_v7  ;;  %v1137_v29 = vmul.f32 %v1121_v10, %v1073_v19 }
 0x2dc   : > { %v2328_v21 = vpop.eup %2327  ;;  %v1097_v50 = vmul.f32 0.70710677, %v2971_v14  ;;  %v1136_v22 = vmul.f32 %v1120_v13, %v1072_v9  ;;  %2132 = vmatpush1.bf16.msra.mxu0 %v2913_v8  ;;  %v1081_v62 = vmul.f32 0.5, %v2971_v14 }
 0x2dd   : > { %v2330_v23 = vpop.eup %2329  ;;  %v1123_v25 = vadd.f32 1.0, %v2328_v21  ;;  %v1096_v51 = vmul.f32 0.70710677, %v1042_v20  ;;  %v1973_v28 = vpop.f32.mrb[12].mxu1  ;;  %2134 = vmatprep.subr.bf16.mxu0 %v2915_v24  ;;  %v1080_v61 = vmul.f32 0.5, %v1042_v20  ;;  %v1411_v21 = vld [vmem:[%s3234_s9 + $0x68] sm:$0xff] }
 0x2de   : > { %v1122_v32 = vadd.f32 1.0, %v2330_v23  ;;  %2339 = verf.f32 %v1097_v50  ;;  %v1057_v27 = vadd.f32 %v1973_v28, %v2949_v16  ;;  %v1051_v35 = vpop.f32.mrb[13].mxu1  ;;  %2012 = vmatprep.mubr.f32.mxu0 %v1136_v22  ;;  %v1413_v50 = vld [vmem:[%s3234_s9 + $0x78] sm:$0xff]  ;;  %v1410_v23 = vld [vmem:[%s3234_s9 + $0x60] sm:$0xff]  ;;  %v1415_v28 = vld [vmem:[%s3234_s9 + $0x88] sm:$0xff] }
 0x2df   : > { %2341 = verf.f32 %v1096_v51  ;;  %v1052_v37 = vadd.f32 %v2949_v16, %v1051_v35  ;;  %2013 = vmatmul.mubr.f32.gmra.mrb[18].mxu0 %v1137_v29  ;;  %v1139_v41 = vmul.f32 %v1123_v25, %v1075_v36  ;;  %v2141_v22 = vpack.c.bf16 %v1413_v50, %v1411_v21  ;;  %v1412_v25 = vld [vmem:[%s3234_s9 + $0x70] sm:$0xff]  ;;  %v1417_v29 = vld [vmem:[%s3234_s9 + $0x98] sm:$0xff]  ;;  %v1419_v36 = vld [vmem:[%s3234_s9 + $0xa8] sm:$0xff] }
 0x2e0   : > { %v2332_v8 = vpop.eup %2331  ;;  %v1099_v34 = vmul.f32 0.70710677, %v1057_v27  ;;  %v1138_v38 = vmul.f32 %v1122_v32, %v1074_v31  ;;  %2136 = vmatpush1.bf16.msra.mxu0 %v2931_v30  ;;  %v1083_v0 = vmul.f32 0.5, %v1057_v27  ;;  %v2143_v51 = vpack.c.bf16 %v1412_v25, %v1410_v23  ;;  %v1414_v32 = vld [vmem:[%s3234_s9 + $0x80] sm:$0xff]  ;;  %v1416_v27 = vld [vmem:[%s3234_s9 + $0x90] sm:$0xff] }
 0x2e1   : > { %v2334_v39 = vpop.eup %2333  ;;  %v1125_v15 = vadd.f32 1.0, %v2332_v8  ;;  %v1098_v24 = vmul.f32 0.70710677, %v1052_v37  ;;  %v1976_v40 = vpop.f32.mrb[14].mxu1  ;;  %2138 = vmatprep.subr.bf16.mxu0 %v2933_v17  ;;  %v1082_v6 = vmul.f32 0.5, %v1052_v37  ;;  %2164 = vmatprep.subr.bf16.mxu1 %v2141_v22  ;;  %v2145_v31 = vpack.c.bf16 %v1417_v29, %v1415_v28  ;;  %v1421_v37 = vld [vmem:[%s3234_s9 + $0xb8] sm:$0xff] }
 0x2e2   : > { %v1124_v26 = vadd.f32 1.0, %v2334_v39  ;;  %2343 = verf.f32 %v1099_v34  ;;  %v1067_v44 = vadd.f32 %v1976_v40, %v2949_v16  ;;  %v1061_v46 = vpop.f32.mrb[15].mxu1  ;;  %2015 = vmatprep.mubr.f32.mxu0 %v1138_v38  ;;  %2172 = vmatpush1.bf16.msra.mxu1 %v2143_v51  ;;  %v2147_v35 = vpack.c.bf16 %v1416_v27, %v1414_v32  ;;  %v1418_v34 = vld [vmem:[%s3234_s9 + $0xa0] sm:$0xff]  ;;  %v1420_v38 = vld [vmem:[%s3234_s9 + $0xb0] sm:$0xff] }
 0x2e3   : > { %2345 = verf.f32 %v1098_v24  ;;  %v1062_v48 = vadd.f32 %v2949_v16, %v1061_v46  ;;  %2016 = vmatmul.mubr.f32.gmra.mrb[20].mxu0 %v1139_v41  ;;  %v1141_v54 = vmul.f32 %v1125_v15, %v1077_v47  ;;  %2165 = vmatprep.subr.bf16.mxu1 %v2145_v31  ;;  %v2149_v8 = vpack.c.bf16 %v1421_v37, %v1419_v36  ;;  %v1423_v15 = vld [vmem:[%s3234_s9 + $0xc8] sm:$0xff]  ;;  %v1425_v24 = vld [vmem:[%s3234_s9 + $0xd8] sm:$0xff]  ;;  %v1422_v41 = vld [vmem:[%s3234_s9 + $0xc0] sm:$0xff] }
 0x2e4   : > { %v2336_v30 = vpop.eup %2335  ;;  %v1101_v49 = vmul.f32 0.70710677, %v1067_v44  ;;  %v1140_v52 = vmul.f32 %v1124_v26, %v1076_v45  ;;  %2140 = vmatpush1.bf16.msra.mxu0 %v2943_v33  ;;  %v1085_v14 = vmul.f32 0.5, %v1067_v44  ;;  %v2151_v39 = vpack.c.bf16 %v1420_v38, %v1418_v34  ;;  %v1424_v45 = vld [vmem:[%s3234_s9 + $0xd0] sm:$0xff]  ;;  %v1427_v44 = vld [vmem:[%s3234_s9 + $0xe8] sm:$0xff]  ;;  %v1429_v46 = vld [vmem:[%s3234_s9 + $0xf8] sm:$0xff] }
 0x2e5   : > { %v2338_v42 = vpop.eup %2337  ;;  %v1127_v17 = vadd.f32 1.0, %v2336_v30  ;;  %v1100_v43 = vmul.f32 0.70710677, %v1062_v48  ;;  %v1084_v13 = vmul.f32 0.5, %v1062_v48  ;;  %2142 = vmatprep.subr.bf16.mxu0 %v2141_v22  ;;  %v2153_v40 = vpack.c.bf16 %v1425_v24, %v1423_v15  ;;  %v1426_v48 = vld [vmem:[%s3234_s9 + $0xe0] sm:$0xff]  ;;  %v1428_v30 = vld [vmem:[%s3234_s9 + $0xf0] sm:$0xff] }
 0x2e6   : > { %v1126_v56 = vadd.f32 1.0, %v2338_v42  ;;  %2347 = verf.f32 %v1101_v49  ;;  %2018 = vmatprep.mubr.f32.mxu0 %v1140_v52  ;;  %2173 = vmatpush1.bf16.msra.mxu1 %v2147_v35  ;;  %v2155_v26 = vpack.c.bf16 %v1424_v45, %v1422_v41  ;;  %v2157_v47 = vpack.c.bf16 %v1429_v46, %v1427_v44  ;;  %v3053_v42 = vld [vmem:[%s3233_s8] ss:$0 sm:$0xff] }
 0x2e7   : > { %2349 = verf.f32 %v1100_v43  ;;  %2019 = vmatmul.mubr.f32.gmra.mrb[22].mxu0 %v1141_v54  ;;  %v1143_v59 = vmul.f32 %v1127_v17, %v1079_v53  ;;  %2166 = vmatprep.subr.bf16.mxu1 %v2149_v8  ;;  %v2159_v49 = vpack.c.bf16 %v1428_v30, %v1426_v48  ;;  %v2545_v52 = vmov 0.0  }
 0x2e8   : > { %v2340_v16 = vpop.eup %2339  ;;  %v1142_v57 = vmul.f32 %v1126_v56, %v1078_v55  ;;  %2144 = vmatpush1.bf16.msra.mxu0 %v2143_v51  ;;  %1530 = vmatprep.mubr.f32.mxu1 %v2545_v52 }
 0x2e9   : > { %v2342_v58 = vpop.eup %2341  ;;  %v1129_v60 = vadd.f32 1.0, %v2340_v16  ;;  %2146 = vmatprep.subr.bf16.mxu0 %v2145_v31 }
 0x2ea   : > { %v1128_v33 = vadd.f32 1.0, %v2342_v58  ;;  %2021 = vmatprep.mubr.f32.mxu0 %v1142_v57  ;;  %2174 = vmatpush1.bf16.msra.mxu1 %v2151_v39 }
 0x2eb   : > { %2022 = vmatmul.mubr.f32.gmra.mrb[24].mxu0 %v1143_v59  ;;  %v1145_v5 = vmul.f32 %v1129_v60, %v1081_v62  ;;  %2167 = vmatprep.subr.bf16.mxu1 %v2153_v40 }
 0x2ec   : > { %v2344_v1 = vpop.eup %2343  ;;  %v1144_v2 = vmul.f32 %v1128_v33, %v1080_v61  ;;  %2148 = vmatpush1.bf16.msra.mxu0 %v2147_v35 }
 0x2ed   : > { %v2346_v3 = vpop.eup %2345  ;;  %v1131_v4 = vadd.f32 1.0, %v2344_v1  ;;  %2150 = vmatprep.subr.bf16.mxu0 %v2149_v8 }
 0x2ee   : > { %v1130_v63 = vadd.f32 1.0, %v2346_v3  ;;  %2024 = vmatprep.mubr.f32.mxu0 %v1144_v2  ;;  %2175 = vmatpush1.bf16.msra.mxu1 %v2155_v26 }
 0x2ef   : > { %2025 = vmatmul.mubr.f32.gmra.mrb[26].mxu0 %v1145_v5  ;;  %v1147_v9 = vmul.f32 %v1131_v4, %v1083_v0  ;;  %2168 = vmatprep.subr.bf16.mxu1 %v2157_v47 }
 0x2f0   : > { %v2348_v7 = vpop.eup %2347  ;;  %v1146_v10 = vmul.f32 %v1130_v63, %v1082_v6  ;;  %2152 = vmatpush1.bf16.msra.mxu0 %v2151_v39 }
 0x2f1   : > { %v2350_v11 = vpop.eup %2349  ;;  %v1133_v12 = vadd.f32 1.0, %v2348_v7  ;;  %2154 = vmatprep.subr.bf16.mxu0 %v2153_v40 }
 0x2f2   : > { %v1132_v18 = vadd.f32 1.0, %v2350_v11  ;;  %2027 = vmatprep.mubr.f32.mxu0 %v1146_v10  ;;  %2176 = vmatpush1.bf16.msra.mxu1 %v2159_v49 }
 0x2f3   : > { %2028 = vmatmul.mubr.f32.gmra.mrb[28].mxu0 %v1147_v9  ;;  %v1149_v20 = vmul.f32 %v1133_v12, %v1085_v14 }
 0x2f4   : > { %v1148_v19 = vmul.f32 %v1132_v18, %v1084_v13  ;;  %2156 = vmatpush1.bf16.msra.mxu0 %v2155_v26 }
 0x2f5   : > { %2158 = vmatprep.subr.bf16.mxu0 %v2157_v47 }
 0x2f6   : > { %2030 = vmatprep.mubr.f32.mxu0 %v1148_v19 }
 0x2f7   : > { %2031 = vmatmul.mubr.f32.gmra.mrb[30].mxu0 %v1149_v20 }
 0x2f8   : > { %2160 = vmatpush1.bf16.msra.mxu0 %v2159_v49  ;;  %1506 = vmatprep.mubr.f32.mxu0 %v2545_v52 }
 0x3ae   : > { %v2011_v17 = vpop.f32.mrb[16].mxu0 }
 0x3af   : > { %v1245_v43 = vadd.f32 %v2011_v17, %v3053_v42  ;;  %v1239_v54 = vpop.f32.mrb[17].mxu0 }
 0x3b0   : > { %v1240_v55 = vadd.f32 %v3053_v42, %v1239_v54 }
 0x3b1   : > { %v1335_v56 = vmul.f32 0.70710677, %v1245_v43  ;;  %v1319_v23 = vmul.f32 0.5, %v1245_v43 }
 0x3b2   : > { %v1334_v53 = vmul.f32 0.70710677, %v1240_v55  ;;  %v2014_v16 = vpop.f32.mrb[18].mxu0  ;;  %v1318_v9 = vmul.f32 0.5, %v1240_v55 }
 0x3b3   : > { %2351 = verf.f32 %v1335_v56  ;;  %v1255_v57 = vadd.f32 %v2014_v16, %v3053_v42  ;;  %v1249_v58 = vpop.f32.mrb[19].mxu0 }
 0x3b4   : > { %2353 = verf.f32 %v1334_v53  ;;  %v1250_v60 = vadd.f32 %v3053_v42, %v1249_v58 }
 0x3b5   : > { %v1337_v59 = vmul.f32 0.70710677, %v1255_v57  ;;  %v1321_v46 = vmul.f32 0.5, %v1255_v57 }
 0x3b6   : > { %v1336_v61 = vmul.f32 0.70710677, %v1250_v60  ;;  %v2017_v33 = vpop.f32.mrb[20].mxu0  ;;  %v1320_v37 = vmul.f32 0.5, %v1250_v60 }
 0x3b7   : > { %v1265_v62 = vadd.f32 %v2017_v33, %v3053_v42  ;;  %v1259_v1 = vpop.f32.mrb[21].mxu0 }
 0x3b8   : > { %2355 = verf.f32 %v1336_v61  ;;  %v1260_v2 = vadd.f32 %v3053_v42, %v1259_v1 }
 0x3b9   : > { %v1339_v3 = vmul.f32 0.70710677, %v1265_v62  ;;  %2357 = verf.f32 %v1337_v59  ;;  %v1323_v47 = vmul.f32 0.5, %v1265_v62 }
 0x3ba   : > { %v1338_v4 = vmul.f32 0.70710677, %v1260_v2  ;;  %v2020_v5 = vpop.f32.mrb[22].mxu0  ;;  %v1322_v8 = vmul.f32 0.5, %v1260_v2 }
 0x3bb   : > { %2359 = verf.f32 %v1339_v3  ;;  %v1269_v6 = vpop.f32.mrb[23].mxu0  ;;  %v3062_v63 = vadd.f32 %v2020_v5, %v3053_v42 }
 0x3bc   : > { %2361 = verf.f32 %v1338_v4  ;;  %v1270_v0 = vadd.f32 %v3053_v42, %v1269_v6 }
 0x3bd   : > { %v2352_v7 = vpop.eup %2351  ;;  %v1341_v14 = vmul.f32 0.70710677, %v3062_v63  ;;  %v1325_v59 = vmul.f32 0.5, %v3062_v63 }
 0x3be   : > { %v2354_v10 = vpop.eup %2353  ;;  %v1340_v11 = vmul.f32 0.70710677, %v1270_v0  ;;  %v2023_v12 = vpop.f32.mrb[24].mxu0  ;;  %v1367_v20 = vadd.f32 1.0, %v2352_v7  ;;  %v1324_v56 = vmul.f32 0.5, %v1270_v0 }
 0x3bf   : > { %v1366_v13 = vadd.f32 1.0, %v2354_v10  ;;  %v1279_v18 = vpop.f32.mrb[25].mxu0  ;;  %v3070_v28 = vadd.f32 %v2023_v12, %v3053_v42 }
 0x3c0   : > { %2363 = verf.f32 %v1340_v11  ;;  %v3067_v19 = vadd.f32 %v3053_v42, %v1279_v18  ;;  %v1383_v27 = vmul.f32 %v1367_v20, %v1319_v23 }
 0x3c1   : > { %v1382_v21 = vmul.f32 %v1366_v13, %v1318_v9  ;;  %2365 = verf.f32 %v1341_v14  ;;  %v1343_v39 = vmul.f32 0.70710677, %v3070_v28  ;;  %v1327_v7 = vmul.f32 0.5, %v3070_v28 }
 0x3c2   : > { %v2356_v50 = vpop.eup %2355  ;;  %v2026_v22 = vpop.f32.mrb[26].mxu0  ;;  %v1342_v29 = vmul.f32 0.70710677, %v3067_v19  ;;  %v1326_v3 = vmul.f32 0.5, %v3067_v19 }
 0x3c3   : > { %v1289_v25 = vpop.f32.mrb[27].mxu0  ;;  %1507 = vmatmul.mubr.f32.vlgmr.msra.gmra.mrb[32].mxu0 %v1382_v21  ;;  %v2358_v51 = vpop.eup %2357  ;;  %v1368_v32 = vadd.f32 1.0, %v2356_v50  ;;  %v1295_v30 = vadd.f32 %v2026_v22, %v3053_v42 }
 0x3c4   : > { %1512 = vmatprep.mubr.f32.mxu0 %v2545_v52  ;;  %2367 = verf.f32 %v1342_v29  ;;  %v1290_v15 = vadd.f32 %v3053_v42, %v1289_v25  ;;  %v1369_v24 = vadd.f32 1.0, %v2358_v51 }
 0x3c5   : > { %v2360_v31 = vpop.eup %2359  ;;  %v1384_v45 = vmul.f32 %v1368_v32, %v1320_v37  ;;  %2369 = verf.f32 %v1343_v39  ;;  %v1345_v53 = vmul.f32 0.70710677, %v1295_v30  ;;  %v1329_v50 = vmul.f32 0.5, %v1295_v30 }
 0x3c6   : > { %v2362_v35 = vpop.eup %2361  ;;  %v2029_v36 = vpop.f32.mrb[28].mxu0  ;;  %v1371_v40 = vadd.f32 1.0, %v2360_v31  ;;  %v1344_v49 = vmul.f32 0.70710677, %v1290_v15  ;;  %v1385_v43 = vmul.f32 %v1369_v24, %v1321_v46  ;;  %v1328_v18 = vmul.f32 0.5, %v1290_v15 }
 0x3c7   : > { %v1370_v34 = vadd.f32 1.0, %v2362_v35  ;;  %v1299_v38 = vpop.f32.mrb[29].mxu0  ;;  %1513 = vmatmul.mubr.f32.gmra.mrb[34].mxu0 %v1383_v27  ;;  %v1305_v61 = vadd.f32 %v2029_v36, %v3053_v42  ;;  %v1432_v39 = vlaneseq }
 0x3c8   : > { %1518 = vmatprep.mubr.f32.mxu0 %v2545_v52  ;;  %v1387_v54 = vmul.f32 %v1371_v40, %v1323_v47  ;;  %2371 = verf.f32 %v1344_v49  ;;  %v1300_v16 = vadd.f32 %v3053_v42, %v1299_v38  ;;  %v1430_v40 = vld [vmem:[%s3235_s10] sm:$0x3] }
 0x3c9   : > { %v1386_v41 = vmul.f32 %v1370_v34, %v1322_v8  ;;  %2373 = verf.f32 %v1345_v53  ;;  %v1347_v4 = vmul.f32 0.70710677, %v1305_v61  ;;  %v1331_v31 = vmul.f32 0.5, %v1305_v61 }
 0x3ca   : > { %v2364_v26 = vpop.eup %2363  ;;  %v2032_v44 = vpop.f32.mrb[30].mxu0  ;;  %v1346_v33 = vmul.f32 0.70710677, %v1300_v16  ;;  %v1330_v25 = vmul.f32 0.5, %v1300_v16  ;;  %v1433_v15 = vshrl.u32 %v1432_v39, 7 }
 0x3cb   : > { %v1309_v48 = vpop.f32.mrb[31].mxu0  ;;  %1519 = vmatmul.mubr.f32.gmra.mrb[36].mxu0 %v1384_v45  ;;  %1531 = vmatmul.mubr.f32.vlgmr.msra.gmra.mrb[16].mxu1 %v1386_v41  ;;  %v1372_v17 = vadd.f32 1.0, %v2364_v26  ;;  %v2366_v55 = vpop.eup %2365  ;;  %v1315_v10 = vadd.f32 %v2032_v44, %v3053_v42 }
 0x3cc   : > { %1524 = vmatprep.mubr.f32.mxu0 %v2545_v52  ;;  %1536 = vmatprep.mubr.f32.mxu1 %v2545_v52  ;;  %v1373_v57 = vadd.f32 1.0, %v2366_v55  ;;  %2375 = verf.f32 %v1346_v33  ;;  %v1310_v5 = vadd.f32 %v3053_v42, %v1309_v48  ;;  %v1434_v24 = vsub.s32 0, %v1433_v15 }
 0x3cd   : > { %v1388_v58 = vmul.f32 %v1372_v17, %v1324_v56  ;;  %2377 = verf.f32 %v1347_v4  ;;  %v1349_v14 = vmul.f32 0.70710677, %v1315_v10  ;;  %v1333_v34 = vmul.f32 0.5, %v1315_v10 }
 0x3ce   : > { %v2368_v60 = vpop.eup %2367  ;;  %v1389_v1 = vmul.f32 %v1373_v57, %v1325_v59  ;;  %v1348_v11 = vmul.f32 0.70710677, %v1310_v5  ;;  %v1332_v36 = vmul.f32 0.5, %v1310_v5  ;;  %v1438_v41 = vsub.s32 1, %v1433_v15 }
 0x3cf   : > { %1525 = vmatmul.mubr.f32.gmra.mrb[38].mxu0 %v1385_v43  ;;  %1537 = vmatmul.mubr.f32.gmra.mrb[18].mxu1 %v1387_v54  ;;  %v1374_v62 = vadd.f32 1.0, %v2368_v60  ;;  %v2370_v2 = vpop.eup %2369  ;;  %v3103_v45 = vrot.slane %v1430_v40, %v1434_v24 }
 0x3d0   : > { %1542 = vmatprep.mubr.f32.mxu1 %v2545_v52  ;;  %v1375_v6 = vadd.f32 1.0, %v2370_v2  ;;  %2379 = verf.f32 %v1348_v11  ;;  %v3105_v26 = vrot.slane %v1430_v40, %v1438_v41 }
 0x3d1   : > { %v1390_v63 = vmul.f32 %v1374_v62, %v1326_v3  ;;  %2381 = verf.f32 %v1349_v14 }
 0x3d2   : > { %v2372_v0 = vpop.eup %2371  ;;  %v1391_v9 = vmul.f32 %v1375_v6, %v1327_v7 }
 0x3d3   : > { %1543 = vmatmul.mubr.f32.gmra.mrb[20].mxu1 %v1388_v58  ;;  %v1376_v12 = vadd.f32 1.0, %v2372_v0  ;;  %v2374_v13 = vpop.eup %2373 }
 0x3d4   : > { %1548 = vmatprep.mubr.f32.mxu1 %v2545_v52  ;;  %v1377_v19 = vadd.f32 1.0, %v2374_v13 }
 0x3d5   : > { %v1392_v20 = vmul.f32 %v1376_v12, %v1328_v18 }
 0x3d6   : > { %v2376_v21 = vpop.eup %2375  ;;  %v1393_v22 = vmul.f32 %v1377_v19, %v1329_v50 }
 0x3d7   : > { %1549 = vmatmul.mubr.f32.gmra.mrb[22].mxu1 %v1389_v1  ;;  %v1378_v42 = vadd.f32 1.0, %v2376_v21  ;;  %v2378_v23 = vpop.eup %2377 }
 0x3d8   : > { %1554 = vmatprep.mubr.f32.mxu1 %v2545_v52  ;;  %v1379_v51 = vadd.f32 1.0, %v2378_v23 }
 0x3d9   : > { %v1394_v28 = vmul.f32 %v1378_v42, %v1330_v25 }
 0x3da   : > { %v2380_v29 = vpop.eup %2379  ;;  %v1395_v27 = vmul.f32 %v1379_v51, %v1331_v31 }
 0x3db   : > { %1555 = vmatmul.mubr.f32.gmra.mrb[24].mxu1 %v1390_v63  ;;  %v1380_v32 = vadd.f32 1.0, %v2380_v29  ;;  %v2382_v35 = vpop.eup %2381 }
 0x3dc   : > { %1560 = vmatprep.mubr.f32.mxu1 %v2545_v52  ;;  %v1381_v37 = vadd.f32 1.0, %v2382_v35 }
 0x3dd   : > { %v1396_v8 = vmul.f32 %v1380_v32, %v1332_v36 }
 0x3de   : > { %v1397_v38 = vmul.f32 %v1381_v37, %v1333_v34 }
 0x3df   : > { %1561 = vmatmul.mubr.f32.gmra.mrb[26].mxu1 %v1391_v9 }
 0x3e0   : > { %1566 = vmatprep.mubr.f32.mxu1 %v2545_v52 }
 0x3e3   : > { %1567 = vmatmul.mubr.f32.gmra.mrb[28].mxu1 %v1392_v20 }
 0x3e4   : > { %1572 = vmatprep.mubr.f32.mxu1 %v2545_v52 }
 0x3e7   : > { %1573 = vmatmul.mubr.f32.gmra.mrb[30].mxu1 %v1393_v22 }
 0x3e8   : > { %1578 = vmatprep.mubr.f32.mxu1 %v2545_v52 }
 0x3eb   : > { %1579 = vmatmul.mubr.f32.gmra.mrb[32].mxu1 %v1394_v28 }
 0x3ec   : > { %1584 = vmatprep.mubr.f32.mxu1 %v2545_v52 }
 0x3ef   : > { %1585 = vmatmul.mubr.f32.gmra.mrb[34].mxu1 %v1395_v27 }
 0x3f0   : > { %1590 = vmatprep.mubr.f32.mxu1 %v2545_v52 }
 0x3f3   : > { %1591 = vmatmul.mubr.f32.gmra.mrb[36].mxu1 %v1396_v8 }
 0x3f4   : > { %1596 = vmatprep.mubr.f32.mxu1 %v2545_v52 }
 0x3f7   : > { %1597 = vmatmul.mubr.f32.gmra.mrb[38].mxu1 %v1397_v38 }
 0x496   : > { %v1508_v44 = vpop.f32.mrb[32].mxu0 }
 0x497   : > { %v1509_v52 = vadd.f32 %v1508_v44, %v3103_v45  ;;  %v1510_v46 = vpop.f32.mrb[33].mxu0 }
 0x498   : > { %v1511_v47 = vadd.f32 %v1510_v46, %v3105_v26 }
 0x499   : > { %1603 = vst [vmem:[%s3109_s15] sm:$0xff] %v1509_v52 }
 0x49a   : > { %1604 = vst [vmem:[%s3109_s15 + $0x8] sm:$0xff] %v1511_v47  ;;  %v1514_v48 = vpop.f32.mrb[34].mxu0 }
 0x49b   : > { %v1515_v30 = vadd.f32 %v1514_v48, %v3103_v45  ;;  %v1516_v49 = vpop.f32.mrb[35].mxu0 }
 0x49c   : > { %v1517_v17 = vadd.f32 %v1516_v49, %v3105_v26 }
 0x49d   : > { %1605 = vst [vmem:[%s3109_s15 + $0x10] sm:$0xff] %v1515_v30 }
 0x49e   : > { %1606 = vst [vmem:[%s3109_s15 + $0x18] sm:$0xff] %v1517_v17  ;;  %v1520_v43 = vpop.f32.mrb[36].mxu0  ;;  %v1532_v54 = vpop.f32.mrb[16].mxu1 }
 0x49f   : > { %v1521_v55 = vadd.f32 %v1520_v43, %v3103_v45  ;;  %v1533_v56 = vadd.f32 %v1532_v54, %v3103_v45  ;;  %v1522_v53 = vpop.f32.mrb[37].mxu0  ;;  %v1534_v16 = vpop.f32.mrb[17].mxu1 }
 0x4a0   : > { %v1523_v57 = vadd.f32 %v1522_v53, %v3105_v26  ;;  %v1535_v58 = vadd.f32 %v1534_v16, %v3105_v26 }
 0x4a1   : > { %1607 = vst [vmem:[%s3109_s15 + $0x20] sm:$0xff] %v1521_v55  ;;  %1611 = vst [vmem:[%s3109_s15 + $0x40] sm:$0xff] %v1533_v56 }
 0x4a2   : > { %1608 = vst [vmem:[%s3109_s15 + $0x28] sm:$0xff] %v1523_v57  ;;  %1612 = vst [vmem:[%s3109_s15 + $0x48] sm:$0xff] %v1535_v58  ;;  %v1526_v60 = vpop.f32.mrb[38].mxu0  ;;  %v1538_v59 = vpop.f32.mrb[18].mxu1 }
 0x4a3   : > { %v1527_v61 = vadd.f32 %v1526_v60, %v3103_v45  ;;  %v1539_v33 = vadd.f32 %v1538_v59, %v3103_v45  ;;  %v1528_v62 = vpop.f32.mrb[39].mxu0  ;;  %v1540_v1 = vpop.f32.mrb[19].mxu1 }
 0x4a4   : > { %v1529_v2 = vadd.f32 %v1528_v62, %v3105_v26  ;;  %v1541_v3 = vadd.f32 %v1540_v1, %v3105_v26 }
 0x4a5   : > { %1609 = vst [vmem:[%s3109_s15 + $0x30] sm:$0xff] %v1527_v61  ;;  %1613 = vst [vmem:[%s3109_s15 + $0x50] sm:$0xff] %v1539_v33 }
 0x4a6   : > { %1610 = vst [vmem:[%s3109_s15 + $0x38] sm:$0xff] %v1529_v2  ;;  %1614 = vst [vmem:[%s3109_s15 + $0x58] sm:$0xff] %v1541_v3  ;;  %v1544_v4 = vpop.f32.mrb[20].mxu1 }
 0x4a7   : > { %v1545_v5 = vadd.f32 %v1544_v4, %v3103_v45  ;;  %v1546_v6 = vpop.f32.mrb[21].mxu1 }
 0x4a8   : > { %v1547_v63 = vadd.f32 %v1546_v6, %v3105_v26 }
 0x4a9   : > { %1615 = vst [vmem:[%s3109_s15 + $0x60] sm:$0xff] %v1545_v5 }
 0x4aa   : > { %1616 = vst [vmem:[%s3109_s15 + $0x68] sm:$0xff] %v1547_v63  ;;  %v1550_v0 = vpop.f32.mrb[22].mxu1 }
 0x4ab   : > { %v1551_v7 = vadd.f32 %v1550_v0, %v3103_v45  ;;  %v1552_v10 = vpop.f32.mrb[23].mxu1 }
 0x4ac   : > { %v1553_v11 = vadd.f32 %v1552_v10, %v3105_v26 }
 0x4ad   : > { %1617 = vst [vmem:[%s3109_s15 + $0x70] sm:$0xff] %v1551_v7 }
 0x4ae   : > { %1618 = vst [vmem:[%s3109_s15 + $0x78] sm:$0xff] %v1553_v11  ;;  %v1556_v12 = vpop.f32.mrb[24].mxu1 }
 0x4af   : > { %v1557_v9 = vadd.f32 %v1556_v12, %v3103_v45  ;;  %v1558_v13 = vpop.f32.mrb[25].mxu1 }
 0x4b0   : > { %v1559_v18 = vadd.f32 %v1558_v13, %v3105_v26 }
 0x4b1   : > { %1619 = vst [vmem:[%s3109_s15 + $0x80] sm:$0xff] %v1557_v9 }
 0x4b2   : > { %1620 = vst [vmem:[%s3109_s15 + $0x88] sm:$0xff] %v1559_v18  ;;  %v1562_v14 = vpop.f32.mrb[26].mxu1 }
 0x4b3   : > { %v1563_v19 = vadd.f32 %v1562_v14, %v3103_v45  ;;  %v1564_v20 = vpop.f32.mrb[27].mxu1 }
 0x4b4   : > { %v1565_v21 = vadd.f32 %v1564_v20, %v3105_v26 }
 0x4b5   : > { %1621 = vst [vmem:[%s3109_s15 + $0x90] sm:$0xff] %v1563_v19 }
 0x4b6   : > { %1622 = vst [vmem:[%s3109_s15 + $0x98] sm:$0xff] %v1565_v21  ;;  %v1568_v50 = vpop.f32.mrb[28].mxu1 }
 0x4b7   : > { %v1569_v42 = vadd.f32 %v1568_v50, %v3103_v45  ;;  %v1570_v22 = vpop.f32.mrb[29].mxu1 }
 0x4b8   : > { %v1571_v23 = vadd.f32 %v1570_v22, %v3105_v26 }
 0x4b9   : > { %1623 = vst [vmem:[%s3109_s15 + $0xa0] sm:$0xff] %v1569_v42 }
 0x4ba   : > { %1624 = vst [vmem:[%s3109_s15 + $0xa8] sm:$0xff] %v1571_v23  ;;  %v1574_v25 = vpop.f32.mrb[30].mxu1 }
 0x4bb   : > { %v1575_v51 = vadd.f32 %v1574_v25, %v3103_v45  ;;  %v1576_v28 = vpop.f32.mrb[31].mxu1 }
 0x4bc   : > { %v1577_v29 = vadd.f32 %v1576_v28, %v3105_v26 }
 0x4bd   : > { %1625 = vst [vmem:[%s3109_s15 + $0xb0] sm:$0xff] %v1575_v51 }
 0x4be   : > { %1626 = vst [vmem:[%s3109_s15 + $0xb8] sm:$0xff] %v1577_v29  ;;  %v1580_v31 = vpop.f32.mrb[32].mxu1 }
 0x4bf   : > { %v1581_v32 = vadd.f32 %v1580_v31, %v3103_v45  ;;  %v1582_v27 = vpop.f32.mrb[33].mxu1 }
 0x4c0   : > { %v1583_v35 = vadd.f32 %v1582_v27, %v3105_v26 }
 0x4c1   : > { %1627 = vst [vmem:[%s3109_s15 + $0xc0] sm:$0xff] %v1581_v32 }
 0x4c2   : > { %1628 = vst [vmem:[%s3109_s15 + $0xc8] sm:$0xff] %v1583_v35  ;;  %v1586_v36 = vpop.f32.mrb[34].mxu1 }
 0x4c3   : > { %v1587_v37 = vadd.f32 %v1586_v36, %v3103_v45  ;;  %v1588_v8 = vpop.f32.mrb[35].mxu1 }
 0x4c4   : > { %v1589_v34 = vadd.f32 %v1588_v8, %v3105_v26 }
 0x4c5   : > { %1629 = vst [vmem:[%s3109_s15 + $0xd0] sm:$0xff] %v1587_v37 }
 0x4c6   : > { %1630 = vst [vmem:[%s3109_s15 + $0xd8] sm:$0xff] %v1589_v34  ;;  %v1592_v38 = vpop.f32.mrb[36].mxu1 }
 0x4c7   : > { %v1593_v39 = vadd.f32 %v1592_v38, %v3103_v45  ;;  %v1594_v15 = vpop.f32.mrb[37].mxu1 }
 0x4c8   : > { %v1595_v24 = vadd.f32 %v1594_v15, %v3105_v26 }
 0x4c9   : > { %1631 = vst [vmem:[%s3109_s15 + $0xe0] sm:$0xff] %v1593_v39 }
 0x4ca   : > { %1632 = vst [vmem:[%s3109_s15 + $0xe8] sm:$0xff] %v1595_v24  ;;  %v1598_v40 = vpop.f32.mrb[38].mxu1 }
 0x4cb   : > { %v1599_v41 = vadd.f32 %v1598_v40, %v3103_v45  ;;  %v1600_v44 = vpop.f32.mrb[39].mxu1 }
 0x4cc   : > { %v1601_v52 = vadd.f32 %v1600_v44, %v3105_v26 }
 0x4cd   : > { %1633 = vst [vmem:[%s3109_s15 + $0xf0] sm:$0xff] %v1599_v41 }
 0x4ce   : > { %1634 = vst [vmem:[%s3109_s15 + $0xf8] sm:$0xff] %v1601_v52 }
 0x4cf   : > { %2480 = shalt.err (!%p2477_p9)
}
 0x4d0   : > { %s2481_s25 = scalar_lea.hbm %s3175_s24, 4096  ;;  %s2485_s16 = scalar_lea.hbm %s3264_s22, 8192 }
 0x4d1   : > { %p2482_p2 = scmp.ne.s32.totalorder %s3175_s24, %s2481_s25  ;;  %p2486_p5 = scmp.lt.u32.totalorder %s3175_s24, %s3264_s22 }
 0x4d2   : > { %p2487_p10 = scmp.lt.u32.totalorder %s2485_s16, %s2481_s25  ;;  %p2489_p4 = scmp.lt.u32.totalorder %s2481_s25, %s3175_s24 }
 0x4d3   : > { %p2483_p0 = pnand %p2482_p2, %p3265_p7 }
 0x4d4   : > { %p2488_p12 = por %p2487_p10, %p2486_p5 }
 0x4d5   : > { %p2484_p3 = pneg %p2483_p0 }
 0x4d6   : > { %p2490_p8 = por %p2489_p4, %p2488_p12 }
 0x4d8   : > { %p2491_p11 = pnand %p2490_p8, %p2484_p3 }
 0x4da   : > { %2494 = shalt.err (!%p2491_p11)
}
 0x4db   : > { %s2547_s15 = smov 256   ;;  %s2548_s11 = smov 16  }
 0x4dc   : > { %2189 = dma.vmem_to_hbm [thread:$0]  (%p3265_p7), %s3177_s23, 4096, %s3175_s24, %s3184_s21, %s2547_s15, %s2547_s15, %s2548_s11  }
 0x4dd PF: > { %s3266_s29 = sld [smem:[#allocation14_spill]]  ;;  %s3267_s13 = sld [smem:[#allocation12_spill]] }
 0x4de   : > { %s3268_s26 = sld [smem:[#allocation17_spill]] }
 0x4e3   : > { %p2211_p13 = scmp.ge.s32.totalorder %s3266_s29, 2  ;;  %s1665_s17 = sand.u32 1, %s3267_s13  }
 0x4e4   : > { %p3269_p1 = scmp.ne.s32.totalorder %s3268_s26, 0  ;;  %s1666_s20 = scalar_lea.sflag [#allocation4], %s1665_s17 }
 0x4e6   : > { %p2202_p6 = pnand %p2211_p13, %p3269_p1 }
 0x4e8   : > { %2520 = dma.done.wait (!%p2202_p6), %s1666_s20, 4096  }
 0x4e9   : > { %2522 = vsyncadd (!%p2202_p6), %s1666_s20, 4294963200  ;;  %s3270_s20 = sld [smem:[#allocation15_spill]]  ;;  %s3271_s28 = sld [smem:[#allocation13_spill]] }
 0x4ea   : > { %s3272_s19 = sld [smem:[#allocation16_spill]]  ;;  %s3273_s17 = smov %s2529_s18 }
 0x4ef   : > { %p23_p9 = scmp.ge.s32.totalorder %s3270_s20, 4   ;;  %s3274_s18 = smov %s3271_s28 }
 0x4f1   :  { %25 = sbr.rel (!%p23_p9) target bundleno = 7 (0x7), region = 112 }
 0x4f8   :  { %1671 = vsyncpa [#allocation3], 1 }
 0x4f9   :  { %1673 = vsyncpa [#allocation3 + $0x1], 1 }
 0x4fa   :  { %1674 = vsyncpa [#allocation6], 1 }
 0x4fb   :  { %1675 = vsyncpa [#allocation4], 1 }
 0x4fc   :  { %1677 = vsyncpa [#allocation4 + $0x1], 1 }

</bundles_post_ra>
